<compile_context>
chip_gen: v6e
topology: v6e:2x2x1
jax: 0.10.0
libtpu: 0.0.40
codegen_flags: <defaults>
</compile_context>

<pallas_src>
from functools import partial
from typing import NamedTuple

import jax
import jax.numpy as jnp
from jax.experimental import pallas as pl
from jax.experimental.pallas import tpu as pltpu


def _round_up(n, m):
    return ((n + m - 1) // m) * m


def _pad2(a, rows, cols, value=0.0):
    r, c = a.shape
    return jnp.pad(a, ((0, rows - r), (0, cols - c)), constant_values=value)


class _Dims(NamedTuple):
    C: int
    D: int
    Nc: int
    Ng: int
    Cp: int
    Dp: int
    Ncp: int
    Ngp: int


def _vmem_limit_bytes():
    phys = 64 * 1024 * 1024          # conservative fallback = v7x per-core VMEM
    try:
        phys = int(pltpu.get_tpu_info().vmem_capacity_bytes)
    except Exception:
        pass
    # ~3/4 of physical, capped: ~48 MiB on v7x, ~96 MiB on v5e/v6e (128 MiB).
    return min(3 * phys // 4, 100 * 1024 * 1024)


# ----------------------------------------------------------------------------
# Fused kernel: backbone stand-in (1x1 conv -> ReLU -> GAP) + CBM head.
# One grid step = one batch tile.
#   x_ref    : (Cp, tb*HWp)  channels on sublanes, batch*spatial lane-dense
#   wbbT_ref : (Dp, Cp)      backbone 1x1-conv weight, transposed
#   wcT_ref  : (Dp, Ncp)     W_c^T, zero-padded
#   wgT_ref  : (Ncp, Ngp)    istd * W_g^T (normalization folded in)
#   bg/mean/istd : (1, Ngp)/(1, Ncp)/(1, Ncp) f32 row vectors (bg is folded)
# Outputs (f32, lane-padded): concepts (tb,Ncp), proj_c (tb,Ncp), preds (tb,Ngp)
# ----------------------------------------------------------------------------
def _lfcbm_kernel(x_ref, wbbT_ref, wcT_ref, wgT_ref, bg_ref, mean_ref, istd_ref,
                  conc_ref, projc_ref, preds_ref, *, tb, hwp, inv_hw):
    # Backbone stand-in, transposed so the tiny channel dim sits on sublanes:
    #   ht[d, b*HWp + s] = sum_c wbb[c, d] * x[c, b*HWp + s]
    ht = jnp.dot(wbbT_ref[...], x_ref[...], preferred_element_type=jnp.float32)
    ht = jnp.maximum(ht, 0.0)                          # ReLU (f32 on the VPU)

    # Global average pool: per-batch lane-aligned slice + lane reduce (XLU),
    # then one cheap (Dp, tb) transpose.  No pooling matrix, no wasted MXU work.
    cols = [jnp.sum(ht[:, b * hwp:(b + 1) * hwp], axis=-1, keepdims=True)
            for b in range(tb)]
    featT = jnp.concatenate(cols, axis=-1) * inv_hw    # (Dp, tb), true-HW mean
    feat = featT.T.astype(wcT_ref.dtype)               # (tb, Dp)

    # proj_layer: concepts = feat @ W_c^T   (weights pre-transposed, no .T)
    concepts = jnp.dot(feat, wcT_ref[...], preferred_element_type=jnp.float32)
    conc_ref[...] = concepts                           # unnormalized_concepts

    # (x - mean) * (1/std) for the 'concepts' output (off the matmul path).
    projc_ref[...] = (concepts - mean_ref[...]) * istd_ref[...]

    # Class head with normalization folded into W_g'^T / b'.
    preds_ref[...] = (jnp.dot(concepts.astype(wgT_ref.dtype), wgT_ref[...],
                              preferred_element_type=jnp.float32)
                      + bg_ref[...])


# ----------------------------------------------------------------------------
# One-time weight prep: transpose, pad, fold normalization, cast.  Hoist this
# out of the per-forward path and reuse the returned params across calls.
# ----------------------------------------------------------------------------
def prepare_lfcbm_params(w_bb, W_c, W_g, b_g, proj_mean, proj_std,
                         compute_dtype=jnp.bfloat16):
    C, D = w_bb.shape
    Nc, Dc = W_c.shape
    Ng, Nc2 = W_g.shape
    assert Dc == D and Nc2 == Nc and b_g.shape == (Ng,)

    Cp = _round_up(C, 8)        # channels ride the sublane axis (<=2x pad)
    # NOTE: 128 keeps every matmul N dim / output store lane-dense; could be
    # bumped to 256 on v6e/v7x (2x256 MXU) when the real dims are large.
    Dp, Ncp, Ngp = _round_up(D, 128), _round_up(Nc, 128), _round_up(Ng, 128)

    istd = (1.0 / proj_std).astype(jnp.float32)

    wbbT = _pad2(w_bb.T, Dp, Cp).astype(compute_dtype)                # (Dp, Cp)
    wcT = _pad2(W_c.T, Dp, Ncp).astype(compute_dtype)                 # (Dp, Ncp)
    # Fold (x - mean) / std into the class head:
    #   preds = concepts @ (istd * W_g^T) + (b_g - (mean * istd) @ W_g^T)
    wgT = _pad2(istd[:, None] * W_g.T, Ncp, Ngp).astype(compute_dtype)
    bg = _pad2((b_g - (proj_mean * istd) @ W_g.T).reshape(1, Ng),
               1, Ngp).astype(jnp.float32)
    mean = _pad2(proj_mean.reshape(1, Nc), 1, Ncp).astype(jnp.float32)
    istd_row = _pad2(istd.reshape(1, Nc), 1, Ncp, value=1.0).astype(jnp.float32)

    params = {"wbbT": wbbT, "wcT": wcT, "wgT": wgT,
              "bg": bg, "mean": mean, "istd": istd_row}
    dims = _Dims(C=C, D=D, Nc=Nc, Ng=Ng, Cp=Cp, Dp=Dp, Ncp=Ncp, Ngp=Ngp)
    return params, dims


# ----------------------------------------------------------------------------
# Forward with prepared params (NCHW input, like the PyTorch module).
# ----------------------------------------------------------------------------
@partial(jax.jit, static_argnames=("dims", "batch_tile"))
def lfcbm_forward_prepared(x_nchw, params, dims, batch_tile=64):
    B, C, H, W = x_nchw.shape
    assert C == dims.C
    HW = H * W
    HWp = _round_up(HW, 128)      # keeps tb*HWp lane-tile aligned for any H, W
    cdt = params["wbbT"].dtype

    # Batch tiling in multiples of 8 (sublanes); pad B so no partial tile feeds
    # garbage through the pool.  Try to keep >= 2 grid steps so both v7x
    # TensorCores get work (harmless on v5e/v6e's single core).
    Bp8 = _round_up(B, 8)
    tb = min(_round_up(batch_tile, 8), Bp8)
    if (Bp8 // tb) < 2 and (Bp8 // 8) >= 2 and tb > 8:
        tb = max(8, _round_up(-(-Bp8 // 2), 8))
    Bp = _round_up(B, tb)
    grid = (Bp // tb,)

    # Image layout: channels on sublanes, batch*spatial lane-dense.
    #   (B, C, H, W) -> (Cp, Bp*HWp), column index = b*HWp + s (zero padded).
    x3 = x_nchw.reshape(B, C, HW)
    x3 = jnp.pad(x3, ((0, Bp - B), (0, dims.Cp - C), (0, HWp - HW)))
    xT = jnp.transpose(x3, (1, 0, 2)).reshape(dims.Cp, Bp * HWp).astype(cdt)

    kernel = partial(_lfcbm_kernel, tb=tb, hwp=HWp, inv_hw=1.0 / HW)
    full = lambda i: (0, 0)
    row = lambda i: (i, 0)

    conc, projc, preds = pl.pallas_call(
        kernel,
        out_shape=(
            jax.ShapeDtypeStruct((Bp, dims.Ncp), jnp.float32),  # unnormalized
            jax.ShapeDtypeStruct((Bp, dims.Ncp), jnp.float32),  # concepts
            jax.ShapeDtypeStruct((Bp, dims.Ngp), jnp.float32),  # preds
        ),
        grid=grid,
        in_specs=[
            pl.BlockSpec((dims.Cp, tb * HWp), lambda i: (0, i)),   # x tile
            pl.BlockSpec((dims.Dp, dims.Cp), full),     # Wbb^T   (grid-invariant)
            pl.BlockSpec((dims.Dp, dims.Ncp), full),    # W_c^T   (grid-invariant)
            pl.BlockSpec((dims.Ncp, dims.Ngp), full),   # istd*W_g^T
            pl.BlockSpec((1, dims.Ngp), full),          # folded bias
            pl.BlockSpec((1, dims.Ncp), full),          # proj_mean
            pl.BlockSpec((1, dims.Ncp), full),          # 1/proj_std
        ],
        out_specs=(
            pl.BlockSpec((tb, dims.Ncp), row),
            pl.BlockSpec((tb, dims.Ncp), row),
            pl.BlockSpec((tb, dims.Ngp), row),
        ),
        compiler_params=pltpu.CompilerParams(
            dimension_semantics=("parallel",),          # batch tiles independent
            vmem_limit_bytes=_vmem_limit_bytes(),       # generation-aware
        ),
    )(xT, params["wbbT"], params["wcT"], params["wgT"],
      params["bg"], params["mean"], params["istd"])

    # Slice batch / lane padding back off.
    return {"unnormalized_concepts": conc[:B, :dims.Nc],
            "concepts": projc[:B, :dims.Nc],
            "preds": preds[:B, :dims.Ng]}


# ----------------------------------------------------------------------------
# Convenience one-shot entry point (prep + forward).  For repeated calls, hoist
# prepare_lfcbm_params() out and call lfcbm_forward_prepared directly.
# ----------------------------------------------------------------------------
def lfcbm_forward(x_nchw, w_bb, W_c, W_g, b_g, proj_mean, proj_std,
                  compute_dtype=jnp.bfloat16, batch_tile=64):
    params, dims = prepare_lfcbm_params(w_bb, W_c, W_g, b_g, proj_mean,
                                        proj_std, compute_dtype=compute_dtype)
    return lfcbm_forward_prepared(x_nchw, params, dims=dims,
                                  batch_tile=batch_tile)


if __name__ == "__main__":
    # Small, deterministic shapes consistent with the module's forward.
    B, C, H, W = 2, 4, 16, 16       # input images (NCHW, like PyTorch)
    feat_dim = 32                   # backbone feature dim (W_c.shape[1])
    n_concepts = 16                 # W_c.shape[0] == W_g.shape[1]
    n_classes = 8                   # W_g.shape[0]

    key = jax.random.PRNGKey(0)
    kx, kbb, kwc, kwg, kbg, kmu, ksd = jax.random.split(key, 7)

    x = jax.random.normal(kx, (B, C, H, W), dtype=jnp.float32)
    w_bb = jax.random.normal(kbb, (C, feat_dim), dtype=jnp.float32) * 0.1
    W_c = jax.random.normal(kwc, (n_concepts, feat_dim), dtype=jnp.float32) * 0.1
    W_g = jax.random.normal(kwg, (n_classes, n_concepts), dtype=jnp.float32) * 0.1
    b_g = jax.random.normal(kbg, (n_classes,), dtype=jnp.float32) * 0.1
    proj_mean = jax.random.normal(kmu, (n_concepts,), dtype=jnp.float32) * 0.1
    proj_std = jax.random.uniform(ksd, (n_concepts,), dtype=jnp.float32,
                                  minval=0.5, maxval=1.5)

    # Plain-JAX reference (same math as the PyTorch module + backbone stand-in).
    feat_ref = jnp.mean(jax.nn.relu(jnp.einsum("bchw,cd->bhwd", x, w_bb)),
                        axis=(1, 2))
    conc_ref = feat_ref @ W_c.T
    projc_ref = (conc_ref - proj_mean) / proj_std
    preds_ref = projc_ref @ W_g.T + b_g

    # f32 operands (exact-ish); one-time weight prep hoisted out of the forward.
    params32, dims = prepare_lfcbm_params(w_bb, W_c, W_g, b_g, proj_mean,
                                          proj_std, compute_dtype=jnp.float32)
    out = lfcbm_forward_prepared(x, params32, dims=dims)
    jax.block_until_ready(out)
    assert jnp.allclose(out["unnormalized_concepts"], conc_ref, atol=1e-4)
    assert jnp.allclose(out["concepts"], projc_ref, atol=1e-4)
    assert jnp.allclose(out["preds"], preds_ref, atol=1e-4)

    # bf16 matmul operands (default; f32 accumulation via preferred_element_type).
    out_bf16 = lfcbm_forward(x, w_bb, W_c, W_g, b_g, proj_mean, proj_std)
    jax.block_until_ready(out_bf16)
    assert jnp.allclose(out_bf16["preds"], preds_ref, atol=5e-2, rtol=5e-2)

    print("KERNEL_OK")
</pallas_src>

<mosaic_0001>
module attributes {stable_mosaic.version = 11 : i64} {
  func.func @_lfcbm_kernel(%arg0: i32, %arg1: memref<8x2048xf32, #tpu.memory_space<vmem>>, %arg2: memref<128x8xf32, #tpu.memory_space<vmem>>, %arg3: memref<128x128xf32, #tpu.memory_space<vmem>>, %arg4: memref<128x128xf32, #tpu.memory_space<vmem>>, %arg5: memref<1x128xf32, #tpu.memory_space<vmem>>, %arg6: memref<1x128xf32, #tpu.memory_space<vmem>>, %arg7: memref<1x128xf32, #tpu.memory_space<vmem>>, %arg8: memref<8x128xf32, #tpu.memory_space<vmem>>, %arg9: memref<8x128xf32, #tpu.memory_space<vmem>>, %arg10: memref<8x128xf32, #tpu.memory_space<vmem>>) attributes {dimension_semantics = [#tpu.dimension_semantics<parallel>], iteration_bounds = array<i64: 1>, scalar_prefetch = 0 : i64, scratch_operands = 0 : i64, tpu.core_type = #tpu.core_type<tc>, window_params = [{transform_indices = @transform_0, window_bounds = array<i64: 8, 2048>}, {pipeline_mode = #tpu.pipeline_mode<synchronous>, transform_indices = @transform_1, window_bounds = array<i64: 128, 8>}, {pipeline_mode = #tpu.pipeline_mode<synchronous>, transform_indices = @transform_2, window_bounds = array<i64: 128, 128>}, {pipeline_mode = #tpu.pipeline_mode<synchronous>, transform_indices = @transform_3, window_bounds = array<i64: 128, 128>}, {pipeline_mode = #tpu.pipeline_mode<synchronous>, transform_indices = @transform_4, window_bounds = array<i64: 1, 128>}, {pipeline_mode = #tpu.pipeline_mode<synchronous>, transform_indices = @transform_5, window_bounds = array<i64: 1, 128>}, {pipeline_mode = #tpu.pipeline_mode<synchronous>, transform_indices = @transform_6, window_bounds = array<i64: 1, 128>}, {transform_indices = @transform_7, window_bounds = array<i64: 8, 128>}, {transform_indices = @transform_8, window_bounds = array<i64: 8, 128>}, {transform_indices = @transform_9, window_bounds = array<i64: 8, 128>}]} {
    %c0 = arith.constant 0 : index
    %c0_0 = arith.constant 0 : index
    %0 = vector.load %arg2[%c0, %c0_0] : memref<128x8xf32, #tpu.memory_space<vmem>>, vector<128x8xf32>
    %c0_1 = arith.constant 0 : index
    %c0_2 = arith.constant 0 : index
    %1 = vector.load %arg1[%c0_1, %c0_2] : memref<8x2048xf32, #tpu.memory_space<vmem>>, vector<8x2048xf32>
    %cst = arith.constant dense<0.000000e+00> : vector<128x2048xf32>
    %2 = tpu.matmul %0, %1, %cst {dimension_numbers = #tpu.dot_dimension_numbers<[1], [0], [0], [1], [0, 0, 1, 1], [], []>} : vector<128x8xf32>, vector<8x2048xf32>, vector<128x2048xf32> -> vector<128x2048xf32>
    %cst_3 = arith.constant 0.000000e+00 : f32
    %3 = vector.broadcast %cst_3 : f32 to vector<128x2048xf32>
    %4 = arith.maximumf %2, %3 : vector<128x2048xf32>
    %5 = vector.extract_strided_slice %4 {offsets = [0, 0], sizes = [128, 256], strides = [1, 1]} : vector<128x2048xf32> to vector<128x256xf32>
    %cst_4 = arith.constant dense<0.000000e+00> : vector<128xf32>
    %6 = vector.multi_reduction <add>, %5, %cst_4 [1] : vector<128x256xf32> to vector<128xf32>
    %7 = vector.shape_cast %6 : vector<128xf32> to vector<128x1xf32>
    %8 = vector.extract_strided_slice %4 {offsets = [0, 256], sizes = [128, 256], strides = [1, 1]} : vector<128x2048xf32> to vector<128x256xf32>
    %cst_5 = arith.constant dense<0.000000e+00> : vector<128xf32>
    %9 = vector.multi_reduction <add>, %8, %cst_5 [1] : vector<128x256xf32> to vector<128xf32>
    %10 = vector.shape_cast %9 : vector<128xf32> to vector<128x1xf32>
    %11 = vector.extract_strided_slice %4 {offsets = [0, 512], sizes = [128, 256], strides = [1, 1]} : vector<128x2048xf32> to vector<128x256xf32>
    %cst_6 = arith.constant dense<0.000000e+00> : vector<128xf32>
    %12 = vector.multi_reduction <add>, %11, %cst_6 [1] : vector<128x256xf32> to vector<128xf32>
    %13 = vector.shape_cast %12 : vector<128xf32> to vector<128x1xf32>
    %14 = vector.extract_strided_slice %4 {offsets = [0, 768], sizes = [128, 256], strides = [1, 1]} : vector<128x2048xf32> to vector<128x256xf32>
    %cst_7 = arith.constant dense<0.000000e+00> : vector<128xf32>
    %15 = vector.multi_reduction <add>, %14, %cst_7 [1] : vector<128x256xf32> to vector<128xf32>
    %16 = vector.shape_cast %15 : vector<128xf32> to vector<128x1xf32>
    %17 = vector.extract_strided_slice %4 {offsets = [0, 1024], sizes = [128, 256], strides = [1, 1]} : vector<128x2048xf32> to vector<128x256xf32>
    %cst_8 = arith.constant dense<0.000000e+00> : vector<128xf32>
    %18 = vector.multi_reduction <add>, %17, %cst_8 [1] : vector<128x256xf32> to vector<128xf32>
    %19 = vector.shape_cast %18 : vector<128xf32> to vector<128x1xf32>
    %20 = vector.extract_strided_slice %4 {offsets = [0, 1280], sizes = [128, 256], strides = [1, 1]} : vector<128x2048xf32> to vector<128x256xf32>
    %cst_9 = arith.constant dense<0.000000e+00> : vector<128xf32>
    %21 = vector.multi_reduction <add>, %20, %cst_9 [1] : vector<128x256xf32> to vector<128xf32>
    %22 = vector.shape_cast %21 : vector<128xf32> to vector<128x1xf32>
    %23 = vector.extract_strided_slice %4 {offsets = [0, 1536], sizes = [128, 256], strides = [1, 1]} : vector<128x2048xf32> to vector<128x256xf32>
    %cst_10 = arith.constant dense<0.000000e+00> : vector<128xf32>
    %24 = vector.multi_reduction <add>, %23, %cst_10 [1] : vector<128x256xf32> to vector<128xf32>
    %25 = vector.shape_cast %24 : vector<128xf32> to vector<128x1xf32>
    %26 = vector.extract_strided_slice %4 {offsets = [0, 1792], sizes = [128, 256], strides = [1, 1]} : vector<128x2048xf32> to vector<128x256xf32>
    %cst_11 = arith.constant dense<0.000000e+00> : vector<128xf32>
    %27 = vector.multi_reduction <add>, %26, %cst_11 [1] : vector<128x256xf32> to vector<128xf32>
    %28 = vector.shape_cast %27 : vector<128xf32> to vector<128x1xf32>
    %29 = tpu.concatenate %7, %10, %13, %16, %19, %22, %25, %28 in 1 : vector<128x1xf32>, vector<128x1xf32>, vector<128x1xf32>, vector<128x1xf32>, vector<128x1xf32>, vector<128x1xf32>, vector<128x1xf32>, vector<128x1xf32> -> vector<128x8xf32>
    %cst_12 = arith.constant 3.906250e-03 : f32
    %30 = vector.broadcast %cst_12 : f32 to vector<128x8xf32>
    %31 = arith.mulf %29, %30 : vector<128x8xf32>
    %32 = tpu.transpose %31, [1, 0] : vector<128x8xf32> -> vector<8x128xf32>
    %c0_13 = arith.constant 0 : index
    %c0_14 = arith.constant 0 : index
    %33 = vector.load %arg3[%c0_13, %c0_14] : memref<128x128xf32, #tpu.memory_space<vmem>>, vector<128x128xf32>
    %cst_15 = arith.constant dense<0.000000e+00> : vector<8x128xf32>
    %34 = tpu.matmul %32, %33, %cst_15 {dimension_numbers = #tpu.dot_dimension_numbers<[1], [0], [0], [1], [0, 0, 1, 1], [], []>} : vector<8x128xf32>, vector<128x128xf32>, vector<8x128xf32> -> vector<8x128xf32>
    %c0_16 = arith.constant 0 : index
    %c0_17 = arith.constant 0 : index
    %35 = vector.load %arg8[%c0_16, %c0_17] : memref<8x128xf32, #tpu.memory_space<vmem>>, vector<8x128xf32>
    tpu.vector_store %arg8[%c0_16, %c0_17], %34 {strides = array<i32>} : memref<8x128xf32, #tpu.memory_space<vmem>>, vector<8x128xf32>,
    %c0_18 = arith.constant 0 : index
    %c0_19 = arith.constant 0 : index
    %36 = vector.load %arg6[%c0_18, %c0_19] : memref<1x128xf32, #tpu.memory_space<vmem>>, vector<1x128xf32>
    %37 = vector.broadcast %36 : vector<1x128xf32> to vector<8x128xf32>
    %38 = arith.subf %34, %37 : vector<8x128xf32>
    %c0_20 = arith.constant 0 : index
    %c0_21 = arith.constant 0 : index
    %39 = vector.load %arg7[%c0_20, %c0_21] : memref<1x128xf32, #tpu.memory_space<vmem>>, vector<1x128xf32>
    %40 = vector.broadcast %39 : vector<1x128xf32> to vector<8x128xf32>
    %41 = arith.mulf %38, %40 : vector<8x128xf32>
    %c0_22 = arith.constant 0 : index
    %c0_23 = arith.constant 0 : index
    %42 = vector.load %arg9[%c0_22, %c0_23] : memref<8x128xf32, #tpu.memory_space<vmem>>, vector<8x128xf32>
    tpu.vector_store %arg9[%c0_22, %c0_23], %41 {strides = array<i32>} : memref<8x128xf32, #tpu.memory_space<vmem>>, vector<8x128xf32>,
    %c0_24 = arith.constant 0 : index
    %c0_25 = arith.constant 0 : index
    %43 = vector.load %arg4[%c0_24, %c0_25] : memref<128x128xf32, #tpu.memory_space<vmem>>, vector<128x128xf32>
    %cst_26 = arith.constant dense<0.000000e+00> : vector<8x128xf32>
    %44 = tpu.matmul %34, %43, %cst_26 {dimension_numbers = #tpu.dot_dimension_numbers<[1], [0], [0], [1], [0, 0, 1, 1], [], []>} : vector<8x128xf32>, vector<128x128xf32>, vector<8x128xf32> -> vector<8x128xf32>
    %c0_27 = arith.constant 0 : index
    %c0_28 = arith.constant 0 : index
    %45 = vector.load %arg5[%c0_27, %c0_28] : memref<1x128xf32, #tpu.memory_space<vmem>>, vector<1x128xf32>
    %46 = vector.broadcast %45 : vector<1x128xf32> to vector<8x128xf32>
    %47 = arith.addf %44, %46 : vector<8x128xf32>
    %c0_29 = arith.constant 0 : index
    %c0_30 = arith.constant 0 : index
    %48 = vector.load %arg10[%c0_29, %c0_30] : memref<8x128xf32, #tpu.memory_space<vmem>>, vector<8x128xf32>
    tpu.vector_store %arg10[%c0_29, %c0_30], %47 {strides = array<i32>} : memref<8x128xf32, #tpu.memory_space<vmem>>, vector<8x128xf32>,
    return
  }
  func.func @transform_0(%arg0: i32) -> (i32, i32) {
    %c0_i32 = arith.constant 0 : i32
    %c0_i32_0 = arith.constant 0 : i32
    return %c0_i32, %arg0 : i32, i32
  }
  func.func @transform_1(%arg0: i32) -> (i32, i32) {
    %c0_i32 = arith.constant 0 : i32
    %c0_i32_0 = arith.constant 0 : i32
    %c0_i32_1 = arith.constant 0 : i32
    return %c0_i32, %c0_i32_0 : i32, i32
  }
  func.func @transform_2(%arg0: i32) -> (i32, i32) {
    %c0_i32 = arith.constant 0 : i32
    %c0_i32_0 = arith.constant 0 : i32
    %c0_i32_1 = arith.constant 0 : i32
    return %c0_i32, %c0_i32_0 : i32, i32
  }
  func.func @transform_3(%arg0: i32) -> (i32, i32) {
    %c0_i32 = arith.constant 0 : i32
    %c0_i32_0 = arith.constant 0 : i32
    %c0_i32_1 = arith.constant 0 : i32
    return %c0_i32, %c0_i32_0 : i32, i32
  }
  func.func @transform_4(%arg0: i32) -> (i32, i32) {
    %c0_i32 = arith.constant 0 : i32
    %c0_i32_0 = arith.constant 0 : i32
    %c0_i32_1 = arith.constant 0 : i32
    return %c0_i32, %c0_i32_0 : i32, i32
  }
  func.func @transform_5(%arg0: i32) -> (i32, i32) {
    %c0_i32 = arith.constant 0 : i32
    %c0_i32_0 = arith.constant 0 : i32
    %c0_i32_1 = arith.constant 0 : i32
    return %c0_i32, %c0_i32_0 : i32, i32
  }
  func.func @transform_6(%arg0: i32) -> (i32, i32) {
    %c0_i32 = arith.constant 0 : i32
    %c0_i32_0 = arith.constant 0 : i32
    %c0_i32_1 = arith.constant 0 : i32
    return %c0_i32, %c0_i32_0 : i32, i32
  }
  func.func @transform_7(%arg0: i32) -> (i32, i32) {
    %c0_i32 = arith.constant 0 : i32
    %c0_i32_0 = arith.constant 0 : i32
    return %arg0, %c0_i32 : i32, i32
  }
  func.func @transform_8(%arg0: i32) -> (i32, i32) {
    %c0_i32 = arith.constant 0 : i32
    %c0_i32_0 = arith.constant 0 : i32
    return %arg0, %c0_i32 : i32, i32
  }
  func.func @transform_9(%arg0: i32) -> (i32, i32) {
    %c0_i32 = arith.constant 0 : i32
    %c0_i32_0 = arith.constant 0 : i32
    return %arg0, %c0_i32 : i32, i32
  }
}

</mosaic_0001>

<bundles_post_ra>
// kernel: lfcbm_forward_prepared.1
= control target key start
LH: loop header
LB: loop body
LE: loop exit
PB: predicated region body
PF: predicated region fallthrough
CT: control target
= control target key end

     0   :  { %v2652_v3 = vmov 0.0   ;;  %vm61_vm0 = vcmask 64512   ;;  %vm2038_vm1 = vcmask 7168   ;;  %vm2055_vm2 = vcmask 15360   ;;  %s3629_s0 = inlined_call_operand.vmem [shape: f32[8,2048], index: 0, kind: input, shape index: {}]   ;;  %s3630_s1 = inlined_call_operand.vmem [shape: f32[128,8], index: 1, kind: input, shape index: {}]   ;;  %s3631_s2 = inlined_call_operand.vmem [shape: f32[128,128], index: 2, kind: input, shape index: {}]   ;;  %s3632_s3 = inlined_call_operand.vmem [shape: f32[128,128], index: 3, kind: input, shape index: {}]   ;;  %s3633_s5 = inlined_call_operand.vmem [shape: f32[1,128], index: 5, kind: input, shape index: {}]   ;;  %s3634_s6 = inlined_call_operand.vmem [shape: f32[1,128], index: 6, kind: input, shape index: {}]   ;;  %s3635_s7 = inlined_call_operand.vmem [shape: f32[8,128], index: 7, kind: output, shape index: {0}]   ;;  %s3636_s8 = inlined_call_operand.vmem [shape: f32[8,128], index: 8, kind: output, shape index: {1}]   ;;  %s3637_s4 = inlined_call_operand.vmem [shape: f32[1,128], index: 4, kind: input, shape index: {}]   ;;  %s3638_s9 = inlined_call_operand.vmem [shape: f32[8,128], index: 9, kind: output, shape index: {2}]  }
   0x1   :  { %v46_v0 = vld [vmem:[%s3629_s0 + $0x8] sm:$0xff]  ;;  %v48_v1 = vld [vmem:[%s3629_s0 + $0x18] sm:$0xff]  ;;  %v45_v2 = vld [vmem:[%s3629_s0] sm:$0xff]  ;;  %174 = vmatprep.mubr.f32.mxu0 %v2652_v3  ;;  %335 = vmatprep.mubr.f32.mxu1 %v2652_v3  ;;  %vm2072_vm3 = vcmask 23552   ;;  %vm2089_vm4 = vcmask 31744   ;;  %vm2653_vm5 = vmmov 0  }
   0x2   :  { %140 = vmatprep.subr.mxu0 %v46_v0  ;;  %301 = vmatprep.subr.mxu1 %v48_v1  ;;  %v47_v4 = vld [vmem:[%s3629_s0 + $0x10] sm:$0xff]  ;;  %v2721_v5 = vld [vmem:[%s3630_s1] sm:$0xff]  ;;  %v50_v6 = vld [vmem:[%s3629_s0 + $0x28] sm:$0xff]  ;;  %vm2106_vm6 = vcmask 39936   ;;  %vm2123_vm7 = vcmask 48128   ;;  %vm2140_vm8 = vcmask 56320  }
   0x3   :  { %141 = vmatpush1.msra.mxu0 %v45_v2  ;;  %302 = vmatpush1.msra.mxu1 %v47_v4  ;;  %v52_v7 = vld [vmem:[%s3629_s0 + $0x38] sm:$0xff]  ;;  %v49_v8 = vld [vmem:[%s3629_s0 + $0x20] sm:$0xff]  ;;  %v51_v9 = vld [vmem:[%s3629_s0 + $0x30] sm:$0xff] }
   0x4   :  { %2415 = vmatmul.mubr.msk.f32.vlgmr.msra.gmra.mxu0 %vm61_vm0, %v2721_v5  ;;  %2431 = vmatmul.mubr.msk.f32.vlgmr.msra.gmra.mxu1 %vm61_vm0, %v2721_v5  ;;  %v2742_v10 = vld [vmem:[%s3630_s1 + $0x8] sm:$0xff]  ;;  %v2755_v11 = vld [vmem:[%s3630_s1 + $0x10] sm:$0xff]  ;;  %v56_v13 = vld [vmem:[%s3629_s0 + $0x58] sm:$0xff] }
   0x5   :  { %462 = vmatprep.subr.mxu0 %v50_v6  ;;  %623 = vmatprep.subr.mxu1 %v52_v7  ;;  %v54_v12 = vld [vmem:[%s3629_s0 + $0x48] sm:$0xff]  ;;  %v2772_v14 = vld [vmem:[%s3630_s1 + $0x18] sm:$0xff]  ;;  %v2783_v15 = vld [vmem:[%s3630_s1 + $0x20] sm:$0xff] }
   0x6   :  { %463 = vmatpush1.msra.mxu0 %v49_v8  ;;  %624 = vmatpush1.msra.mxu1 %v51_v9  ;;  %v2794_v16 = vld [vmem:[%s3630_s1 + $0x28] sm:$0xff]  ;;  %v2805_v17 = vld [vmem:[%s3630_s1 + $0x30] sm:$0xff]  ;;  %v2816_v18 = vld [vmem:[%s3630_s1 + $0x38] sm:$0xff] }
   0x7   :  { %180 = vmatprep.mubr.f32.mxu0 %v2652_v3  ;;  %341 = vmatprep.mubr.f32.mxu1 %v2652_v3  ;;  %v2827_v19 = vld [vmem:[%s3630_s1 + $0x40] sm:$0xff]  ;;  %v2838_v20 = vld [vmem:[%s3630_s1 + $0x48] sm:$0xff]  ;;  %v2849_v21 = vld [vmem:[%s3630_s1 + $0x50] sm:$0xff] }
   0x8   :  { %2416 = vmatmul.mubr.msk.f32.gmra.mxu0 %vm61_vm0, %v2742_v10  ;;  %2432 = vmatmul.mubr.msk.f32.gmra.mxu1 %vm61_vm0, %v2742_v10  ;;  %v2860_v22 = vld [vmem:[%s3630_s1 + $0x58] sm:$0xff]  ;;  %v2871_v23 = vld [vmem:[%s3630_s1 + $0x60] sm:$0xff]  ;;  %v2882_v24 = vld [vmem:[%s3630_s1 + $0x68] sm:$0xff] }
   0x9   :  { %186 = vmatprep.mubr.f32.mxu0 %v2652_v3  ;;  %347 = vmatprep.mubr.f32.mxu1 %v2652_v3  ;;  %v2893_v25 = vld [vmem:[%s3630_s1 + $0x70] sm:$0xff]  ;;  %v2904_v26 = vld [vmem:[%s3630_s1 + $0x78] sm:$0xff]  ;;  %v53_v27 = vld [vmem:[%s3629_s0 + $0x40] sm:$0xff] }
   0xa   :  { %784 = vmatprep.subr.mxu0 %v54_v12  ;;  %945 = vmatprep.subr.mxu1 %v56_v13  ;;  %v55_v28 = vld [vmem:[%s3629_s0 + $0x50] sm:$0xff]  ;;  %v58_v29 = vld [vmem:[%s3629_s0 + $0x68] sm:$0xff]  ;;  %v60_v30 = vld [vmem:[%s3629_s0 + $0x78] sm:$0xff] }
   0xb   :  { %v57_v31 = vld [vmem:[%s3629_s0 + $0x60] sm:$0xff]  ;;  %v59_v32 = vld [vmem:[%s3629_s0 + $0x70] sm:$0xff] }
   0xc   :  { %2417 = vmatmul.mubr.msk.f32.gmra.mxu0 %vm61_vm0, %v2755_v11  ;;  %2433 = vmatmul.mubr.msk.f32.gmra.mxu1 %vm61_vm0, %v2755_v11 }
   0xd   :  { %192 = vmatprep.mubr.f32.mxu0 %v2652_v3  ;;  %353 = vmatprep.mubr.f32.mxu1 %v2652_v3 }
  0x10   :  { %2418 = vmatmul.mubr.msk.f32.gmra.mxu0 %vm61_vm0, %v2772_v14  ;;  %2434 = vmatmul.mubr.msk.f32.gmra.mxu1 %vm61_vm0, %v2772_v14 }
  0x11   :  { %198 = vmatprep.mubr.f32.mxu0 %v2652_v3  ;;  %359 = vmatprep.mubr.f32.mxu1 %v2652_v3 }
  0x14   :  { %2419 = vmatmul.mubr.msk.f32.gmra.mxu0 %vm61_vm0, %v2783_v15  ;;  %2435 = vmatmul.mubr.msk.f32.gmra.mxu1 %vm61_vm0, %v2783_v15 }
  0x15   :  { %204 = vmatprep.mubr.f32.mxu0 %v2652_v3  ;;  %365 = vmatprep.mubr.f32.mxu1 %v2652_v3 }
  0x18   :  { %2420 = vmatmul.mubr.msk.f32.gmra.mxu0 %vm61_vm0, %v2794_v16  ;;  %2436 = vmatmul.mubr.msk.f32.gmra.mxu1 %vm61_vm0, %v2794_v16 }
  0x19   :  { %210 = vmatprep.mubr.f32.mxu0 %v2652_v3  ;;  %371 = vmatprep.mubr.f32.mxu1 %v2652_v3 }
  0x1c   :  { %2421 = vmatmul.mubr.msk.f32.gmra.mxu0 %vm61_vm0, %v2805_v17  ;;  %2437 = vmatmul.mubr.msk.f32.gmra.mxu1 %vm61_vm0, %v2805_v17 }
  0x1d   :  { %216 = vmatprep.mubr.f32.mxu0 %v2652_v3  ;;  %377 = vmatprep.mubr.f32.mxu1 %v2652_v3 }
  0x20   :  { %2422 = vmatmul.mubr.msk.f32.gmra.mxu0 %vm61_vm0, %v2816_v18  ;;  %2438 = vmatmul.mubr.msk.f32.gmra.mxu1 %vm61_vm0, %v2816_v18 }
  0x21   :  { %222 = vmatprep.mubr.f32.mxu0 %v2652_v3  ;;  %383 = vmatprep.mubr.f32.mxu1 %v2652_v3 }
  0x24   :  { %2423 = vmatmul.mubr.msk.f32.gmra.mxu0 %vm61_vm0, %v2827_v19  ;;  %2439 = vmatmul.mubr.msk.f32.gmra.mxu1 %vm61_vm0, %v2827_v19 }
  0x25   :  { %228 = vmatprep.mubr.f32.mxu0 %v2652_v3  ;;  %389 = vmatprep.mubr.f32.mxu1 %v2652_v3 }
  0x28   :  { %2424 = vmatmul.mubr.msk.f32.gmra.mxu0 %vm61_vm0, %v2838_v20  ;;  %2440 = vmatmul.mubr.msk.f32.gmra.mxu1 %vm61_vm0, %v2838_v20 }
  0x29   :  { %234 = vmatprep.mubr.f32.mxu0 %v2652_v3  ;;  %395 = vmatprep.mubr.f32.mxu1 %v2652_v3 }
  0x2c   :  { %2425 = vmatmul.mubr.msk.f32.gmra.mxu0 %vm61_vm0, %v2849_v21  ;;  %2441 = vmatmul.mubr.msk.f32.gmra.mxu1 %vm61_vm0, %v2849_v21 }
  0x2d   :  { %240 = vmatprep.mubr.f32.mxu0 %v2652_v3  ;;  %401 = vmatprep.mubr.f32.mxu1 %v2652_v3 }
  0x30   :  { %2426 = vmatmul.mubr.msk.f32.gmra.mxu0 %vm61_vm0, %v2860_v22  ;;  %2442 = vmatmul.mubr.msk.f32.gmra.mxu1 %vm61_vm0, %v2860_v22 }
  0x31   :  { %246 = vmatprep.mubr.f32.mxu0 %v2652_v3  ;;  %407 = vmatprep.mubr.f32.mxu1 %v2652_v3 }
  0x34   :  { %2427 = vmatmul.mubr.msk.f32.gmra.mxu0 %vm61_vm0, %v2871_v23  ;;  %2443 = vmatmul.mubr.msk.f32.gmra.mxu1 %vm61_vm0, %v2871_v23 }
  0x35   :  { %252 = vmatprep.mubr.f32.mxu0 %v2652_v3  ;;  %413 = vmatprep.mubr.f32.mxu1 %v2652_v3 }
  0x38   :  { %2428 = vmatmul.mubr.msk.f32.gmra.mxu0 %vm61_vm0, %v2882_v24  ;;  %2444 = vmatmul.mubr.msk.f32.gmra.mxu1 %vm61_vm0, %v2882_v24 }
  0x39   :  { %258 = vmatprep.mubr.f32.mxu0 %v2652_v3  ;;  %419 = vmatprep.mubr.f32.mxu1 %v2652_v3 }
  0x3c   :  { %2429 = vmatmul.mubr.msk.f32.gmra.mxu0 %vm61_vm0, %v2893_v25  ;;  %2445 = vmatmul.mubr.msk.f32.gmra.mxu1 %vm61_vm0, %v2893_v25 }
  0x3d   :  { %264 = vmatprep.mubr.f32.mxu0 %v2652_v3  ;;  %425 = vmatprep.mubr.f32.mxu1 %v2652_v3 }
  0x40   :  { %2430 = vmatmul.mubr.msk.f32.gmra.mxu0 %vm61_vm0, %v2904_v26  ;;  %2446 = vmatmul.mubr.msk.f32.gmra.mxu1 %vm61_vm0, %v2904_v26 }
  0x41   :  { %496 = vmatprep.mubr.f32.mxu0 %v2652_v3  ;;  %657 = vmatprep.mubr.f32.mxu1 %v2652_v3 }
  0x44   :  { %2447 = vmatmul.mubr.msk.f32.vlgmr.msra.gmra.mxu0 %vm61_vm0, %v2721_v5  ;;  %2463 = vmatmul.mubr.msk.f32.vlgmr.msra.gmra.mxu1 %vm61_vm0, %v2721_v5 }
  0x45   :  { %785 = vmatpush1.msra.mxu0 %v53_v27  ;;  %946 = vmatpush1.msra.mxu1 %v55_v28 }
  0x46   :  { %502 = vmatprep.mubr.f32.mxu0 %v2652_v3  ;;  %663 = vmatprep.mubr.f32.mxu1 %v2652_v3 }
  0x47   :  { %1106 = vmatprep.subr.mxu0 %v58_v29  ;;  %1267 = vmatprep.subr.mxu1 %v60_v30 }
  0x48   :  { %2448 = vmatmul.mubr.msk.f32.gmra.mxu0 %vm61_vm0, %v2742_v10  ;;  %2464 = vmatmul.mubr.msk.f32.gmra.mxu1 %vm61_vm0, %v2742_v10 }
  0x49   :  { %508 = vmatprep.mubr.f32.mxu0 %v2652_v3  ;;  %669 = vmatprep.mubr.f32.mxu1 %v2652_v3 }
  0x4c   :  { %2449 = vmatmul.mubr.msk.f32.gmra.mxu0 %vm61_vm0, %v2755_v11  ;;  %2465 = vmatmul.mubr.msk.f32.gmra.mxu1 %vm61_vm0, %v2755_v11 }
  0x4d   :  { %514 = vmatprep.mubr.f32.mxu0 %v2652_v3  ;;  %675 = vmatprep.mubr.f32.mxu1 %v2652_v3 }
  0x50   :  { %2450 = vmatmul.mubr.msk.f32.gmra.mxu0 %vm61_vm0, %v2772_v14  ;;  %2466 = vmatmul.mubr.msk.f32.gmra.mxu1 %vm61_vm0, %v2772_v14 }
  0x51   :  { %520 = vmatprep.mubr.f32.mxu0 %v2652_v3  ;;  %681 = vmatprep.mubr.f32.mxu1 %v2652_v3 }
  0x54   :  { %2451 = vmatmul.mubr.msk.f32.gmra.mxu0 %vm61_vm0, %v2783_v15  ;;  %2467 = vmatmul.mubr.msk.f32.gmra.mxu1 %vm61_vm0, %v2783_v15 }
  0x55   :  { %526 = vmatprep.mubr.f32.mxu0 %v2652_v3  ;;  %687 = vmatprep.mubr.f32.mxu1 %v2652_v3 }
  0x58   :  { %2452 = vmatmul.mubr.msk.f32.gmra.mxu0 %vm61_vm0, %v2794_v16  ;;  %2468 = vmatmul.mubr.msk.f32.gmra.mxu1 %vm61_vm0, %v2794_v16 }
  0x59   :  { %532 = vmatprep.mubr.f32.mxu0 %v2652_v3  ;;  %693 = vmatprep.mubr.f32.mxu1 %v2652_v3 }
  0x5c   :  { %2453 = vmatmul.mubr.msk.f32.gmra.mxu0 %vm61_vm0, %v2805_v17  ;;  %2469 = vmatmul.mubr.msk.f32.gmra.mxu1 %vm61_vm0, %v2805_v17 }
  0x5d   :  { %538 = vmatprep.mubr.f32.mxu0 %v2652_v3  ;;  %699 = vmatprep.mubr.f32.mxu1 %v2652_v3 }
  0x60   :  { %2454 = vmatmul.mubr.msk.f32.gmra.mxu0 %vm61_vm0, %v2816_v18  ;;  %2470 = vmatmul.mubr.msk.f32.gmra.mxu1 %vm61_vm0, %v2816_v18 }
  0x61   :  { %544 = vmatprep.mubr.f32.mxu0 %v2652_v3  ;;  %705 = vmatprep.mubr.f32.mxu1 %v2652_v3 }
  0x64   :  { %2455 = vmatmul.mubr.msk.f32.gmra.mxu0 %vm61_vm0, %v2827_v19  ;;  %2471 = vmatmul.mubr.msk.f32.gmra.mxu1 %vm61_vm0, %v2827_v19 }
  0x65   :  { %550 = vmatprep.mubr.f32.mxu0 %v2652_v3  ;;  %711 = vmatprep.mubr.f32.mxu1 %v2652_v3 }
  0x68   :  { %2456 = vmatmul.mubr.msk.f32.gmra.mxu0 %vm61_vm0, %v2838_v20  ;;  %2472 = vmatmul.mubr.msk.f32.gmra.mxu1 %vm61_vm0, %v2838_v20 }
  0x69   :  { %556 = vmatprep.mubr.f32.mxu0 %v2652_v3  ;;  %717 = vmatprep.mubr.f32.mxu1 %v2652_v3 }
  0x6c   :  { %2457 = vmatmul.mubr.msk.f32.gmra.mxu0 %vm61_vm0, %v2849_v21  ;;  %2473 = vmatmul.mubr.msk.f32.gmra.mxu1 %vm61_vm0, %v2849_v21 }
  0x6d   :  { %562 = vmatprep.mubr.f32.mxu0 %v2652_v3  ;;  %723 = vmatprep.mubr.f32.mxu1 %v2652_v3 }
  0x70   :  { %2458 = vmatmul.mubr.msk.f32.gmra.mxu0 %vm61_vm0, %v2860_v22  ;;  %2474 = vmatmul.mubr.msk.f32.gmra.mxu1 %vm61_vm0, %v2860_v22 }
  0x71   :  { %568 = vmatprep.mubr.f32.mxu0 %v2652_v3  ;;  %729 = vmatprep.mubr.f32.mxu1 %v2652_v3 }
  0x74   :  { %2459 = vmatmul.mubr.msk.f32.gmra.mxu0 %vm61_vm0, %v2871_v23  ;;  %2475 = vmatmul.mubr.msk.f32.gmra.mxu1 %vm61_vm0, %v2871_v23 }
  0x75   :  { %574 = vmatprep.mubr.f32.mxu0 %v2652_v3  ;;  %735 = vmatprep.mubr.f32.mxu1 %v2652_v3 }
  0x78   :  { %2460 = vmatmul.mubr.msk.f32.gmra.mxu0 %vm61_vm0, %v2882_v24  ;;  %2476 = vmatmul.mubr.msk.f32.gmra.mxu1 %vm61_vm0, %v2882_v24 }
  0x79   :  { %580 = vmatprep.mubr.f32.mxu0 %v2652_v3  ;;  %741 = vmatprep.mubr.f32.mxu1 %v2652_v3 }
  0x7c   :  { %2461 = vmatmul.mubr.msk.f32.gmra.mxu0 %vm61_vm0, %v2893_v25  ;;  %2477 = vmatmul.mubr.msk.f32.gmra.mxu1 %vm61_vm0, %v2893_v25 }
  0x7d   :  { %586 = vmatprep.mubr.f32.mxu0 %v2652_v3  ;;  %747 = vmatprep.mubr.f32.mxu1 %v2652_v3 }
  0x80   :  { %2462 = vmatmul.mubr.msk.f32.gmra.mxu0 %vm61_vm0, %v2904_v26  ;;  %2478 = vmatmul.mubr.msk.f32.gmra.mxu1 %vm61_vm0, %v2904_v26 }
  0x81   :  { %818 = vmatprep.mubr.f32.mxu0 %v2652_v3  ;;  %979 = vmatprep.mubr.f32.mxu1 %v2652_v3 }
  0x84   :  { %2479 = vmatmul.mubr.msk.f32.vlgmr.msra.gmra.mxu0 %vm61_vm0, %v2721_v5  ;;  %2495 = vmatmul.mubr.msk.f32.vlgmr.msra.gmra.mxu1 %vm61_vm0, %v2721_v5 }
  0x85   :  { %1107 = vmatpush1.msra.mxu0 %v57_v31  ;;  %1268 = vmatpush1.msra.mxu1 %v59_v32 }
  0x86   :  { %824 = vmatprep.mubr.f32.mxu0 %v2652_v3  ;;  %985 = vmatprep.mubr.f32.mxu1 %v2652_v3 }
  0x87   :  { %2580 = vmatprep.subr.mxu0 %v2652_v3  ;;  %2615 = vmatprep.subr.mxu1 %v2652_v3 }
  0x88   :  { %2480 = vmatmul.mubr.msk.f32.gmra.mxu0 %vm61_vm0, %v2742_v10  ;;  %2496 = vmatmul.mubr.msk.f32.gmra.mxu1 %vm61_vm0, %v2742_v10 }
  0x89   :  { %830 = vmatprep.mubr.f32.mxu0 %v2652_v3  ;;  %991 = vmatprep.mubr.f32.mxu1 %v2652_v3 }
  0x8c   :  { %2481 = vmatmul.mubr.msk.f32.gmra.mxu0 %vm61_vm0, %v2755_v11  ;;  %2497 = vmatmul.mubr.msk.f32.gmra.mxu1 %vm61_vm0, %v2755_v11 }
  0x8d   :  { %836 = vmatprep.mubr.f32.mxu0 %v2652_v3  ;;  %997 = vmatprep.mubr.f32.mxu1 %v2652_v3 }
  0x90   :  { %2482 = vmatmul.mubr.msk.f32.gmra.mxu0 %vm61_vm0, %v2772_v14  ;;  %2498 = vmatmul.mubr.msk.f32.gmra.mxu1 %vm61_vm0, %v2772_v14 }
  0x91   :  { %842 = vmatprep.mubr.f32.mxu0 %v2652_v3  ;;  %1003 = vmatprep.mubr.f32.mxu1 %v2652_v3 }
  0x94   :  { %2483 = vmatmul.mubr.msk.f32.gmra.mxu0 %vm61_vm0, %v2783_v15  ;;  %2499 = vmatmul.mubr.msk.f32.gmra.mxu1 %vm61_vm0, %v2783_v15 }
  0x95   :  { %848 = vmatprep.mubr.f32.mxu0 %v2652_v3  ;;  %1009 = vmatprep.mubr.f32.mxu1 %v2652_v3 }
  0x98   :  { %2484 = vmatmul.mubr.msk.f32.gmra.mxu0 %vm61_vm0, %v2794_v16  ;;  %2500 = vmatmul.mubr.msk.f32.gmra.mxu1 %vm61_vm0, %v2794_v16 }
  0x99   :  { %854 = vmatprep.mubr.f32.mxu0 %v2652_v3  ;;  %1015 = vmatprep.mubr.f32.mxu1 %v2652_v3 }
  0x9c   :  { %2485 = vmatmul.mubr.msk.f32.gmra.mxu0 %vm61_vm0, %v2805_v17  ;;  %2501 = vmatmul.mubr.msk.f32.gmra.mxu1 %vm61_vm0, %v2805_v17 }
  0x9d   :  { %860 = vmatprep.mubr.f32.mxu0 %v2652_v3  ;;  %1021 = vmatprep.mubr.f32.mxu1 %v2652_v3 }
  0xa0   :  { %2486 = vmatmul.mubr.msk.f32.gmra.mxu0 %vm61_vm0, %v2816_v18  ;;  %2502 = vmatmul.mubr.msk.f32.gmra.mxu1 %vm61_vm0, %v2816_v18 }
  0xa1   :  { %866 = vmatprep.mubr.f32.mxu0 %v2652_v3  ;;  %1027 = vmatprep.mubr.f32.mxu1 %v2652_v3 }
  0xa4   :  { %2487 = vmatmul.mubr.msk.f32.gmra.mxu0 %vm61_vm0, %v2827_v19  ;;  %2503 = vmatmul.mubr.msk.f32.gmra.mxu1 %vm61_vm0, %v2827_v19 }
  0xa5   :  { %872 = vmatprep.mubr.f32.mxu0 %v2652_v3  ;;  %1033 = vmatprep.mubr.f32.mxu1 %v2652_v3 }
  0xa8   :  { %2488 = vmatmul.mubr.msk.f32.gmra.mxu0 %vm61_vm0, %v2838_v20  ;;  %2504 = vmatmul.mubr.msk.f32.gmra.mxu1 %vm61_vm0, %v2838_v20 }
  0xa9   :  { %878 = vmatprep.mubr.f32.mxu0 %v2652_v3  ;;  %1039 = vmatprep.mubr.f32.mxu1 %v2652_v3 }
  0xac   :  { %2489 = vmatmul.mubr.msk.f32.gmra.mxu0 %vm61_vm0, %v2849_v21  ;;  %2505 = vmatmul.mubr.msk.f32.gmra.mxu1 %vm61_vm0, %v2849_v21 }
  0xad   :  { %884 = vmatprep.mubr.f32.mxu0 %v2652_v3  ;;  %1045 = vmatprep.mubr.f32.mxu1 %v2652_v3 }
  0xb0   :  { %2490 = vmatmul.mubr.msk.f32.gmra.mxu0 %vm61_vm0, %v2860_v22  ;;  %2506 = vmatmul.mubr.msk.f32.gmra.mxu1 %vm61_vm0, %v2860_v22 }
  0xb1   :  { %890 = vmatprep.mubr.f32.mxu0 %v2652_v3  ;;  %1051 = vmatprep.mubr.f32.mxu1 %v2652_v3 }
  0xb4   :  { %2491 = vmatmul.mubr.msk.f32.gmra.mxu0 %vm61_vm0, %v2871_v23  ;;  %2507 = vmatmul.mubr.msk.f32.gmra.mxu1 %vm61_vm0, %v2871_v23 }
  0xb5   :  { %896 = vmatprep.mubr.f32.mxu0 %v2652_v3  ;;  %1057 = vmatprep.mubr.f32.mxu1 %v2652_v3 }
  0xb8   :  { %2492 = vmatmul.mubr.msk.f32.gmra.mxu0 %vm61_vm0, %v2882_v24  ;;  %2508 = vmatmul.mubr.msk.f32.gmra.mxu1 %vm61_vm0, %v2882_v24 }
  0xb9   :  { %902 = vmatprep.mubr.f32.mxu0 %v2652_v3  ;;  %1063 = vmatprep.mubr.f32.mxu1 %v2652_v3 }
  0xbc   :  { %2493 = vmatmul.mubr.msk.f32.gmra.mxu0 %vm61_vm0, %v2893_v25  ;;  %2509 = vmatmul.mubr.msk.f32.gmra.mxu1 %vm61_vm0, %v2893_v25 }
  0xbd   :  { %908 = vmatprep.mubr.f32.mxu0 %v2652_v3  ;;  %1069 = vmatprep.mubr.f32.mxu1 %v2652_v3 }
  0xc0   :  { %2494 = vmatmul.mubr.msk.f32.gmra.mxu0 %vm61_vm0, %v2904_v26  ;;  %2510 = vmatmul.mubr.msk.f32.gmra.mxu1 %vm61_vm0, %v2904_v26 }
  0xc1   :  { %1140 = vmatprep.mubr.f32.mxu0 %v2652_v3  ;;  %1301 = vmatprep.mubr.f32.mxu1 %v2652_v3 }
  0xc4   :  { %v176_v33 = vpop.f32.mrf.mxu0  ;;  %v337_v34 = vpop.f32.mrf.mxu1  ;;  %2511 = vmatmul.mubr.msk.f32.vlgmr.msra.gmra.mxu0 %vm61_vm0, %v2721_v5  ;;  %2527 = vmatmul.mubr.msk.f32.vlgmr.msra.gmra.mxu1 %vm61_vm0, %v2721_v5 }
  0xc5   :  { %1146 = vmatprep.mubr.f32.mxu0 %v2652_v3  ;;  %1307 = vmatprep.mubr.f32.mxu1 %v2652_v3  ;;  %v1398_v37 = vmax.f32 %v176_v33, 0.0  ;;  %v1400_v45 = vmax.f32 %v337_v34, 0.0 }
  0xc6   :  { %v178_v35 = vpop.f32.mrf.mxu0  ;;  %v339_v36 = vpop.f32.mrf.mxu1 }
  0xc7   :  { %v1399_v38 = vmax.f32 %v178_v35, 0.0  ;;  %v1401_v41 = vmax.f32 %v339_v36, 0.0 }
  0xc8   :  { %v182_v39 = vpop.f32.mrf.mxu0  ;;  %v343_v40 = vpop.f32.mrf.mxu1  ;;  %2512 = vmatmul.mubr.msk.f32.gmra.mxu0 %vm61_vm0, %v2742_v10  ;;  %2528 = vmatmul.mubr.msk.f32.gmra.mxu1 %vm61_vm0, %v2742_v10 }
  0xc9   :  { %1152 = vmatprep.mubr.f32.mxu0 %v2652_v3  ;;  %1313 = vmatprep.mubr.f32.mxu1 %v2652_v3  ;;  %v1654_v42 = vadd.f32 %v1399_v38, %v1398_v37  ;;  %v1414_v46 = vmax.f32 %v182_v39, 0.0  ;;  %v1702_v51 = vadd.f32 %v1401_v41, %v1400_v45  ;;  %v1416_v55 = vmax.f32 %v343_v40, 0.0 }
  0xca   :  { %v184_v43 = vpop.f32.mrf.mxu0  ;;  %v345_v44 = vpop.f32.mrf.mxu1 }
  0xcb   :  { %v1415_v47 = vmax.f32 %v184_v43, 0.0  ;;  %1655 = vadd.xlane.f32.xlu0 %v1654_v42  ;;  %v1417_v50 = vmax.f32 %v345_v44, 0.0 }
  0xcc   :  { %v188_v48 = vpop.f32.mrf.mxu0  ;;  %v349_v49 = vpop.f32.mrf.mxu1  ;;  %2513 = vmatmul.mubr.msk.f32.gmra.mxu0 %vm61_vm0, %v2755_v11  ;;  %2529 = vmatmul.mubr.msk.f32.gmra.mxu1 %vm61_vm0, %v2755_v11 }
  0xcd   :  { %1158 = vmatprep.mubr.f32.mxu0 %v2652_v3  ;;  %1319 = vmatprep.mubr.f32.mxu1 %v2652_v3  ;;  %v1657_v52 = vadd.f32 %v1415_v47, %v1414_v46  ;;  %v1432_v56 = vmax.f32 %v349_v49, 0.0  ;;  %v1705_v61 = vadd.f32 %v1417_v50, %v1416_v55  ;;  %v1430_v1 = vmax.f32 %v188_v48, 0.0 }
  0xce   :  { %v190_v53 = vpop.f32.mrf.mxu0  ;;  %v351_v54 = vpop.f32.mrf.mxu1 }
  0xcf   :  { %v1433_v57 = vmax.f32 %v351_v54, 0.0  ;;  %1703 = vadd.xlane.f32.xlu0 %v1702_v51  ;;  %1658 = vadd.xlane.f32.xlu1 %v1657_v52  ;;  %v1431_v60 = vmax.f32 %v190_v53, 0.0 }
  0xd0   :  { %v194_v58 = vpop.f32.mrf.mxu0  ;;  %v355_v59 = vpop.f32.mrf.mxu1  ;;  %2514 = vmatmul.mubr.msk.f32.gmra.mxu0 %vm61_vm0, %v2772_v14  ;;  %2530 = vmatmul.mubr.msk.f32.gmra.mxu1 %vm61_vm0, %v2772_v14 }
  0xd1   :  { %1164 = vmatprep.mubr.f32.mxu0 %v2652_v3  ;;  %1325 = vmatprep.mubr.f32.mxu1 %v2652_v3  ;;  %v1708_v62 = vadd.f32 %v1433_v57, %v1432_v56  ;;  %v1446_v2 = vmax.f32 %v194_v58, 0.0  ;;  %v1660_v8 = vadd.f32 %v1431_v60, %v1430_v1  ;;  %v1448_v12 = vmax.f32 %v355_v59, 0.0 }
  0xd2   :  { %v196_v63 = vpop.f32.mrf.mxu0  ;;  %v357_v0 = vpop.f32.mrf.mxu1 }
  0xd3   :  { %v1447_v4 = vmax.f32 %v196_v63, 0.0  ;;  %1706 = vadd.xlane.f32.xlu0 %v1705_v61  ;;  %1709 = vadd.xlane.f32.xlu1 %v1708_v62  ;;  %v1449_v7 = vmax.f32 %v357_v0, 0.0 }
  0xd4   :  { %v200_v5 = vpop.f32.mrf.mxu0  ;;  %v361_v6 = vpop.f32.mrf.mxu1  ;;  %2515 = vmatmul.mubr.msk.f32.gmra.mxu0 %vm61_vm0, %v2783_v15  ;;  %2531 = vmatmul.mubr.msk.f32.gmra.mxu1 %vm61_vm0, %v2783_v15 }
  0xd5   :  { %1170 = vmatprep.mubr.f32.mxu0 %v2652_v3  ;;  %1331 = vmatprep.mubr.f32.mxu1 %v2652_v3  ;;  %v1663_v9 = vadd.f32 %v1447_v4, %v1446_v2  ;;  %v1462_v13 = vmax.f32 %v200_v5, 0.0  ;;  %v1711_v29 = vadd.f32 %v1449_v7, %v1448_v12  ;;  %v1464_v33 = vmax.f32 %v361_v6, 0.0 }
  0xd6   :  { %v202_v10 = vpop.f32.mrf.mxu0  ;;  %v363_v11 = vpop.f32.mrf.mxu1 }
  0xd7   :  { %v1463_v14 = vmax.f32 %v202_v10, 0.0  ;;  %1661 = vadd.xlane.f32.xlu0 %v1660_v8  ;;  %1664 = vadd.xlane.f32.xlu1 %v1663_v9  ;;  %v1465_v15 = vmax.f32 %v363_v11, 0.0 }
  0xd8   :  { %v206_v27 = vpop.f32.mrf.mxu0  ;;  %v367_v28 = vpop.f32.mrf.mxu1  ;;  %2516 = vmatmul.mubr.msk.f32.gmra.mxu0 %vm61_vm0, %v2794_v16  ;;  %2532 = vmatmul.mubr.msk.f32.gmra.mxu1 %vm61_vm0, %v2794_v16 }
  0xd9   :  { %1176 = vmatprep.mubr.f32.mxu0 %v2652_v3  ;;  %1337 = vmatprep.mubr.f32.mxu1 %v2652_v3  ;;  %v1666_v30 = vadd.f32 %v1463_v14, %v1462_v13  ;;  %v1478_v34 = vmax.f32 %v206_v27, 0.0  ;;  %v1714_v38 = vadd.f32 %v1465_v15, %v1464_v33  ;;  %v1480_v42 = vmax.f32 %v367_v28, 0.0 }
  0xda   :  { %v208_v31 = vpop.f32.mrf.mxu0  ;;  %v369_v32 = vpop.f32.mrf.mxu1 }
  0xdb   :  { %v1479_v35 = vmax.f32 %v208_v31, 0.0  ;;  %1712 = vadd.xlane.f32.xlu0 %v1711_v29  ;;  %1667 = vadd.xlane.f32.xlu1 %v1666_v30  ;;  %v1481_v16 = vmax.f32 %v369_v32, 0.0 }
  0xdc   :  { %v212_v36 = vpop.f32.mrf.mxu0  ;;  %v373_v37 = vpop.f32.mrf.mxu1  ;;  %2517 = vmatmul.mubr.msk.f32.gmra.mxu0 %vm61_vm0, %v2805_v17  ;;  %2533 = vmatmul.mubr.msk.f32.gmra.mxu1 %vm61_vm0, %v2805_v17 }
  0xdd   :  { %1182 = vmatprep.mubr.f32.mxu0 %v2652_v3  ;;  %1343 = vmatprep.mubr.f32.mxu1 %v2652_v3  ;;  %v1669_v39 = vadd.f32 %v1479_v35, %v1478_v34  ;;  %v1494_v43 = vmax.f32 %v212_v36, 0.0  ;;  %v1717_v47 = vadd.f32 %v1481_v16, %v1480_v42  ;;  %v1496_v51 = vmax.f32 %v373_v37, 0.0 }
  0xde   :  { %v214_v40 = vpop.f32.mrf.mxu0  ;;  %v375_v41 = vpop.f32.mrf.mxu1 }
  0xdf   :  { %v1495_v44 = vmax.f32 %v214_v40, 0.0  ;;  %1715 = vadd.xlane.f32.xlu0 %v1714_v38  ;;  %1670 = vadd.xlane.f32.xlu1 %v1669_v39  ;;  %v1497_v17 = vmax.f32 %v375_v41, 0.0 }
  0xe0   :  { %v218_v45 = vpop.f32.mrf.mxu0  ;;  %v379_v46 = vpop.f32.mrf.mxu1  ;;  %2518 = vmatmul.mubr.msk.f32.gmra.mxu0 %vm61_vm0, %v2816_v18  ;;  %2534 = vmatmul.mubr.msk.f32.gmra.mxu1 %vm61_vm0, %v2816_v18 }
  0xe1   :  { %1188 = vmatprep.mubr.f32.mxu0 %v2652_v3  ;;  %1349 = vmatprep.mubr.f32.mxu1 %v2652_v3  ;;  %v1672_v48 = vadd.f32 %v1495_v44, %v1494_v43  ;;  %v1510_v52 = vmax.f32 %v218_v45, 0.0  ;;  %v1720_v56 = vadd.f32 %v1497_v17, %v1496_v51  ;;  %v1512_v60 = vmax.f32 %v379_v46, 0.0 }
  0xe2   :  { %v220_v49 = vpop.f32.mrf.mxu0  ;;  %v381_v50 = vpop.f32.mrf.mxu1 }
  0xe3   :  { %v1511_v53 = vmax.f32 %v220_v49, 0.0  ;;  %1718 = vadd.xlane.f32.xlu0 %v1717_v47  ;;  %1673 = vadd.xlane.f32.xlu1 %v1672_v48  ;;  %v1513_v18 = vmax.f32 %v381_v50, 0.0 }
  0xe4   :  { %v224_v54 = vpop.f32.mrf.mxu0  ;;  %v385_v55 = vpop.f32.mrf.mxu1  ;;  %2519 = vmatmul.mubr.msk.f32.gmra.mxu0 %vm61_vm0, %v2827_v19  ;;  %2535 = vmatmul.mubr.msk.f32.gmra.mxu1 %vm61_vm0, %v2827_v19 }
  0xe5   :  { %1194 = vmatprep.mubr.f32.mxu0 %v2652_v3  ;;  %1355 = vmatprep.mubr.f32.mxu1 %v2652_v3  ;;  %v1675_v57 = vadd.f32 %v1511_v53, %v1510_v52  ;;  %v1526_v61 = vmax.f32 %v224_v54, 0.0  ;;  %v1723_v1 = vadd.f32 %v1513_v18, %v1512_v60  ;;  %v1528_v6 = vmax.f32 %v385_v55, 0.0 }
  0xe6   :  { %v226_v58 = vpop.f32.mrf.mxu0  ;;  %v387_v59 = vpop.f32.mrf.mxu1 }
  0xe7   :  { %v1527_v62 = vmax.f32 %v226_v58, 0.0  ;;  %1721 = vadd.xlane.f32.xlu0 %v1720_v56  ;;  %1676 = vadd.xlane.f32.xlu1 %v1675_v57  ;;  %v1529_v19 = vmax.f32 %v387_v59, 0.0 }
  0xe8   :  { %v230_v63 = vpop.f32.mrf.mxu0  ;;  %v391_v0 = vpop.f32.mrf.mxu1  ;;  %2520 = vmatmul.mubr.msk.f32.gmra.mxu0 %vm61_vm0, %v2838_v20  ;;  %2536 = vmatmul.mubr.msk.f32.gmra.mxu1 %vm61_vm0, %v2838_v20 }
  0xe9   :  { %1200 = vmatprep.mubr.f32.mxu0 %v2652_v3  ;;  %1361 = vmatprep.mubr.f32.mxu1 %v2652_v3  ;;  %v1678_v2 = vadd.f32 %v1527_v62, %v1526_v61  ;;  %v1542_v7 = vmax.f32 %v230_v63, 0.0  ;;  %v1726_v11 = vadd.f32 %v1529_v19, %v1528_v6  ;;  %v1544_v27 = vmax.f32 %v391_v0, 0.0 }
  0xea   :  { %v232_v4 = vpop.f32.mrf.mxu0  ;;  %v393_v5 = vpop.f32.mrf.mxu1 }
  0xeb   :  { %v1543_v8 = vmax.f32 %v232_v4, 0.0  ;;  %1724 = vadd.xlane.f32.xlu0 %v1723_v1  ;;  %1679 = vadd.xlane.f32.xlu1 %v1678_v2  ;;  %v1545_v20 = vmax.f32 %v393_v5, 0.0 }
  0xec   :  { %v236_v9 = vpop.f32.mrf.mxu0  ;;  %v397_v10 = vpop.f32.mrf.mxu1  ;;  %2521 = vmatmul.mubr.msk.f32.gmra.mxu0 %vm61_vm0, %v2849_v21  ;;  %2537 = vmatmul.mubr.msk.f32.gmra.mxu1 %vm61_vm0, %v2849_v21 }
  0xed   :  { %1367 = vmatprep.mubr.f32.mxu1 %v2652_v3  ;;  %1206 = vmatprep.mubr.f32.mxu0 %v2652_v3  ;;  %v1681_v12 = vadd.f32 %v1543_v8, %v1542_v7  ;;  %v1558_v28 = vmax.f32 %v236_v9, 0.0  ;;  %v1729_v31 = vadd.f32 %v1545_v20, %v1544_v27  ;;  %v1560_v35 = vmax.f32 %v397_v10, 0.0 }
  0xee   :  { %v238_v13 = vpop.f32.mrf.mxu0  ;;  %v399_v14 = vpop.f32.mrf.mxu1 }
  0xef   :  { %v1559_v15 = vmax.f32 %v238_v13, 0.0  ;;  %1727 = vadd.xlane.f32.xlu0 %v1726_v11  ;;  %1682 = vadd.xlane.f32.xlu1 %v1681_v12  ;;  %v1561_v21 = vmax.f32 %v399_v14, 0.0 }
  0xf0   :  { %v242_v29 = vpop.f32.mrf.mxu0  ;;  %v403_v30 = vpop.f32.mrf.mxu1  ;;  %2522 = vmatmul.mubr.msk.f32.gmra.mxu0 %vm61_vm0, %v2860_v22  ;;  %2538 = vmatmul.mubr.msk.f32.gmra.mxu1 %vm61_vm0, %v2860_v22 }
  0xf1   :  { %1373 = vmatprep.mubr.f32.mxu1 %v2652_v3  ;;  %1212 = vmatprep.mubr.f32.mxu0 %v2652_v3  ;;  %v1684_v32 = vadd.f32 %v1559_v15, %v1558_v28  ;;  %v1574_v36 = vmax.f32 %v242_v29, 0.0  ;;  %v1732_v39 = vadd.f32 %v1561_v21, %v1560_v35  ;;  %v1576_v43 = vmax.f32 %v403_v30, 0.0 }
  0xf2   :  { %v244_v33 = vpop.f32.mrf.mxu0  ;;  %v405_v34 = vpop.f32.mrf.mxu1 }
  0xf3   :  { %v1575_v37 = vmax.f32 %v244_v33, 0.0  ;;  %1730 = vadd.xlane.f32.xlu0 %v1729_v31  ;;  %1685 = vadd.xlane.f32.xlu1 %v1684_v32  ;;  %v1577_v22 = vmax.f32 %v405_v34, 0.0 }
  0xf4   :  { %v248_v16 = vpop.f32.mrf.mxu0  ;;  %v409_v38 = vpop.f32.mrf.mxu1  ;;  %2523 = vmatmul.mubr.msk.f32.gmra.mxu0 %vm61_vm0, %v2871_v23  ;;  %2539 = vmatmul.mubr.msk.f32.gmra.mxu1 %vm61_vm0, %v2871_v23 }
  0xf5   :  { %1379 = vmatprep.mubr.f32.mxu1 %v2652_v3  ;;  %1218 = vmatprep.mubr.f32.mxu0 %v2652_v3  ;;  %v1687_v40 = vadd.f32 %v1575_v37, %v1574_v36  ;;  %v1590_v44 = vmax.f32 %v248_v16, 0.0  ;;  %v1735_v47 = vadd.f32 %v1577_v22, %v1576_v43  ;;  %v1592_v51 = vmax.f32 %v409_v38, 0.0 }
  0xf6   :  { %v250_v41 = vpop.f32.mrf.mxu0  ;;  %v411_v42 = vpop.f32.mrf.mxu1 }
  0xf7   :  { %v1591_v45 = vmax.f32 %v250_v41, 0.0  ;;  %1733 = vadd.xlane.f32.xlu0 %v1732_v39  ;;  %1688 = vadd.xlane.f32.xlu1 %v1687_v40  ;;  %v1593_v23 = vmax.f32 %v411_v42, 0.0 }
  0xf8   :  { %v254_v46 = vpop.f32.mrf.mxu0  ;;  %v415_v17 = vpop.f32.mrf.mxu1  ;;  %2524 = vmatmul.mubr.msk.f32.gmra.mxu0 %vm61_vm0, %v2882_v24  ;;  %2540 = vmatmul.mubr.msk.f32.gmra.mxu1 %vm61_vm0, %v2882_v24 }
  0xf9   :  { %1224 = vmatprep.mubr.f32.mxu0 %v2652_v3  ;;  %v1690_v48 = vadd.f32 %v1591_v45, %v1590_v44  ;;  %1385 = vmatprep.mubr.f32.mxu1 %v2652_v3  ;;  %v1606_v52 = vmax.f32 %v254_v46, 0.0  ;;  %v1738_v18 = vadd.f32 %v1593_v23, %v1592_v51  ;;  %v1608_v59 = vmax.f32 %v415_v17, 0.0 }
  0xfa   :  { %v256_v49 = vpop.f32.mrf.mxu0  ;;  %v417_v50 = vpop.f32.mrf.mxu1 }
  0xfb   :  { %v1607_v53 = vmax.f32 %v256_v49, 0.0  ;;  %1736 = vadd.xlane.f32.xlu0 %v1735_v47  ;;  %1691 = vadd.xlane.f32.xlu1 %v1690_v48  ;;  %v1609_v24 = vmax.f32 %v417_v50, 0.0 }
  0xfc   :  { %v260_v54 = vpop.f32.mrf.mxu0  ;;  %v421_v55 = vpop.f32.mrf.mxu1  ;;  %2525 = vmatmul.mubr.msk.f32.gmra.mxu0 %vm61_vm0, %v2893_v25  ;;  %2541 = vmatmul.mubr.msk.f32.gmra.mxu1 %vm61_vm0, %v2893_v25 }
  0xfd   :  { %1230 = vmatprep.mubr.f32.mxu0 %v2652_v3  ;;  %v1693_v56 = vadd.f32 %v1607_v53, %v1606_v52  ;;  %1391 = vmatprep.mubr.f32.mxu1 %v2652_v3  ;;  %v1622_v60 = vmax.f32 %v260_v54, 0.0  ;;  %v1741_v0 = vadd.f32 %v1609_v24, %v1608_v59  ;;  %v1624_v4 = vmax.f32 %v421_v55, 0.0 }
  0xfe   :  { %v262_v57 = vpop.f32.mrf.mxu0  ;;  %v423_v58 = vpop.f32.mrf.mxu1 }
  0xff   :  { %v1623_v61 = vmax.f32 %v262_v57, 0.0  ;;  %1739 = vadd.xlane.f32.xlu0 %v1738_v18  ;;  %1694 = vadd.xlane.f32.xlu1 %v1693_v56  ;;  %v1625_v25 = vmax.f32 %v423_v58, 0.0 }
 0x100   :  { %v266_v62 = vpop.f32.mrf.mxu0  ;;  %v427_v63 = vpop.f32.mrf.mxu1  ;;  %2526 = vmatmul.mubr.msk.f32.gmra.mxu0 %vm61_vm0, %v2904_v26  ;;  %2542 = vmatmul.mubr.msk.f32.gmra.mxu1 %vm61_vm0, %v2904_v26 }
 0x101   :  { %v1696_v19 = vadd.f32 %v1623_v61, %v1622_v60  ;;  %v1638_v5 = vmax.f32 %v266_v62, 0.0  ;;  %v1744_v10 = vadd.f32 %v1625_v25, %v1624_v4  ;;  %v1640_v13 = vmax.f32 %v427_v63, 0.0  ;;  %2612 = vmatprep.mubr.msk.f32.mxu0 %vm2653_vm5, %v2652_v3  ;;  %2647 = vmatprep.mubr.msk.f32.mxu1 %vm2653_vm5, %v2652_v3 }
 0x102   :  { %v268_v1 = vpop.f32.mrf.mxu0  ;;  %v429_v2 = vpop.f32.mrf.mxu1 }
 0x103   :  { %v1639_v6 = vmax.f32 %v268_v1, 0.0  ;;  %1742 = vadd.xlane.f32.xlu0 %v1741_v0  ;;  %1697 = vadd.xlane.f32.xlu1 %v1696_v19  ;;  %v1641_v9 = vmax.f32 %v429_v2, 0.0 }
 0x104   :  { %v498_v7 = vpop.f32.mrf.mxu0  ;;  %v659_v8 = vpop.f32.mrf.mxu1 }
 0x105   :  { %v1699_v20 = vadd.f32 %v1639_v6, %v1638_v5  ;;  %v1402_v14 = vmax.f32 %v498_v7, 0.0  ;;  %v1747_v29 = vadd.f32 %v1641_v9, %v1640_v13  ;;  %v1404_v32 = vmax.f32 %v659_v8, 0.0 }
 0x106   :  { %v500_v11 = vpop.f32.mrf.mxu0  ;;  %v661_v12 = vpop.f32.mrf.mxu1 }
 0x107   :  { %v1403_v26 = vmax.f32 %v500_v11, 0.0  ;;  %1745 = vadd.xlane.f32.xlu0 %v1744_v10  ;;  %1700 = vadd.xlane.f32.xlu1 %v1699_v20  ;;  %v1405_v15 = vmax.f32 %v661_v12, 0.0 }
 0x108   :  { %v504_v27 = vpop.f32.mrf.mxu0  ;;  %v665_v28 = vpop.f32.mrf.mxu1 }
 0x109   :  { %v1750_v30 = vadd.f32 %v1403_v26, %v1402_v14  ;;  %v1418_v33 = vmax.f32 %v504_v27, 0.0  ;;  %v1798_v16 = vadd.f32 %v1405_v15, %v1404_v32  ;;  %v1420_v40 = vmax.f32 %v665_v28, 0.0 }
 0x10a   :  { %v506_v21 = vpop.f32.mrf.mxu0  ;;  %v667_v31 = vpop.f32.mrf.mxu1 }
 0x10b   :  { %v1419_v34 = vmax.f32 %v506_v21, 0.0  ;;  %1748 = vadd.xlane.f32.xlu0 %v1747_v29  ;;  %1751 = vadd.xlane.f32.xlu1 %v1750_v30  ;;  %v1421_v37 = vmax.f32 %v667_v31, 0.0 }
 0x10c   :  { %v510_v35 = vpop.f32.mrf.mxu0  ;;  %v671_v36 = vpop.f32.mrf.mxu1 }
 0x10d   :  { %v1753_v38 = vadd.f32 %v1419_v34, %v1418_v33  ;;  %v1436_v41 = vmax.f32 %v671_v36, 0.0  ;;  %v1801_v17 = vadd.f32 %v1421_v37, %v1420_v40  ;;  %v1434_v48 = vmax.f32 %v510_v35, 0.0 }
 0x10e   :  { %v512_v22 = vpop.f32.mrf.mxu0  ;;  %v673_v39 = vpop.f32.mrf.mxu1 }
 0x10f   :  { %v1437_v42 = vmax.f32 %v673_v39, 0.0  ;;  %1799 = vadd.xlane.f32.xlu1 %v1798_v16  ;;  %1754 = vadd.xlane.f32.xlu0 %v1753_v38  ;;  %v1435_v45 = vmax.f32 %v512_v22, 0.0 }
 0x110   :  { %v516_v43 = vpop.f32.mrf.mxu0  ;;  %v677_v44 = vpop.f32.mrf.mxu1 }
 0x111   :  { %v1804_v46 = vadd.f32 %v1437_v42, %v1436_v41  ;;  %v1452_v49 = vmax.f32 %v677_v44, 0.0  ;;  %v1756_v55 = vadd.f32 %v1435_v45, %v1434_v48  ;;  %v1450_v56 = vmax.f32 %v516_v43, 0.0 }
 0x112   :  { %v518_v23 = vpop.f32.mrf.mxu0  ;;  %v679_v47 = vpop.f32.mrf.mxu1 }
 0x113   :  { %v1453_v50 = vmax.f32 %v679_v47, 0.0  ;;  %1805 = vadd.xlane.f32.xlu1 %v1804_v46  ;;  %1802 = vadd.xlane.f32.xlu0 %v1801_v17  ;;  %v1451_v53 = vmax.f32 %v518_v23, 0.0 }
 0x114   :  { %v522_v51 = vpop.f32.mrf.mxu0  ;;  %v683_v52 = vpop.f32.mrf.mxu1 }
 0x115   :  { %v1807_v54 = vadd.f32 %v1453_v50, %v1452_v49  ;;  %v1468_v57 = vmax.f32 %v683_v52, 0.0  ;;  %v1759_v63 = vadd.f32 %v1451_v53, %v1450_v56  ;;  %v1466_v19 = vmax.f32 %v522_v51, 0.0 }
 0x116   :  { %v524_v24 = vpop.f32.mrf.mxu0  ;;  %v685_v18 = vpop.f32.mrf.mxu1 }
 0x117   :  { %v1469_v58 = vmax.f32 %v685_v18, 0.0  ;;  %1808 = vadd.xlane.f32.xlu1 %v1807_v54  ;;  %1757 = vadd.xlane.f32.xlu0 %v1756_v55  ;;  %v1467_v61 = vmax.f32 %v524_v24, 0.0 }
 0x118   :  { %v528_v59 = vpop.f32.mrf.mxu0  ;;  %v689_v60 = vpop.f32.mrf.mxu1 }
 0x119   :  { %v1810_v62 = vadd.f32 %v1469_v58, %v1468_v57  ;;  %v1484_v1 = vmax.f32 %v689_v60, 0.0  ;;  %v1762_v8 = vadd.f32 %v1467_v61, %v1466_v19  ;;  %v1482_v20 = vmax.f32 %v528_v59, 0.0 }
 0x11a   :  { %v530_v25 = vpop.f32.mrf.mxu0  ;;  %v691_v0 = vpop.f32.mrf.mxu1 }
 0x11b   :  { %v1485_v2 = vmax.f32 %v691_v0, 0.0  ;;  %1811 = vadd.xlane.f32.xlu1 %v1810_v62  ;;  %1760 = vadd.xlane.f32.xlu0 %v1759_v63  ;;  %v1483_v6 = vmax.f32 %v530_v25, 0.0 }
 0x11c   :  { %v534_v4 = vpop.f32.mrf.mxu0  ;;  %v695_v5 = vpop.f32.mrf.mxu1 }
 0x11d   :  { %v1813_v7 = vadd.f32 %v1485_v2, %v1484_v1  ;;  %v1500_v11 = vmax.f32 %v695_v5, 0.0  ;;  %v1765_v28 = vadd.f32 %v1483_v6, %v1482_v20  ;;  %v1498_v30 = vmax.f32 %v534_v4, 0.0 }
 0x11e   :  { %v536_v9 = vpop.f32.mrf.mxu0  ;;  %v697_v10 = vpop.f32.mrf.mxu1 }
 0x11f   :  { %v1501_v12 = vmax.f32 %v697_v10, 0.0  ;;  %1814 = vadd.xlane.f32.xlu1 %v1813_v7  ;;  %1763 = vadd.xlane.f32.xlu0 %v1762_v8  ;;  %v1499_v26 = vmax.f32 %v536_v9, 0.0 }
 0x120   :  { %v540_v13 = vpop.f32.mrf.mxu0  ;;  %v701_v14 = vpop.f32.mrf.mxu1 }
 0x121   :  { %v1816_v27 = vadd.f32 %v1501_v12, %v1500_v11  ;;  %v1516_v21 = vmax.f32 %v701_v14, 0.0  ;;  %v1768_v36 = vadd.f32 %v1499_v26, %v1498_v30  ;;  %v1514_v38 = vmax.f32 %v540_v13, 0.0 }
 0x122   :  { %v542_v15 = vpop.f32.mrf.mxu0  ;;  %v703_v29 = vpop.f32.mrf.mxu1 }
 0x123   :  { %v1517_v31 = vmax.f32 %v703_v29, 0.0  ;;  %1817 = vadd.xlane.f32.xlu1 %v1816_v27  ;;  %1766 = vadd.xlane.f32.xlu0 %v1765_v28  ;;  %v1515_v34 = vmax.f32 %v542_v15, 0.0 }
 0x124   :  { %v546_v32 = vpop.f32.mrf.mxu0  ;;  %v707_v33 = vpop.f32.mrf.mxu1 }
 0x125   :  { %v1819_v35 = vadd.f32 %v1517_v31, %v1516_v21  ;;  %v1532_v22 = vmax.f32 %v707_v33, 0.0  ;;  %v1771_v44 = vadd.f32 %v1515_v34, %v1514_v38  ;;  %v1530_v17 = vmax.f32 %v546_v32, 0.0 }
 0x126   :  { %v548_v37 = vpop.f32.mrf.mxu0  ;;  %v709_v16 = vpop.f32.mrf.mxu1 }
 0x127   :  { %v1533_v39 = vmax.f32 %v709_v16, 0.0  ;;  %1820 = vadd.xlane.f32.xlu1 %v1819_v35  ;;  %1769 = vadd.xlane.f32.xlu0 %v1768_v36  ;;  %v1531_v42 = vmax.f32 %v548_v37, 0.0 }
 0x128   :  { %v552_v40 = vpop.f32.mrf.mxu0  ;;  %v713_v41 = vpop.f32.mrf.mxu1 }
 0x129   :  { %v1822_v43 = vadd.f32 %v1533_v39, %v1532_v22  ;;  %v1548_v23 = vmax.f32 %v713_v41, 0.0  ;;  %v1774_v52 = vadd.f32 %v1531_v42, %v1530_v17  ;;  %v1546_v55 = vmax.f32 %v552_v40, 0.0 }
 0x12a   :  { %v554_v45 = vpop.f32.mrf.mxu0  ;;  %v715_v46 = vpop.f32.mrf.mxu1 }
 0x12b   :  { %v1549_v47 = vmax.f32 %v715_v46, 0.0  ;;  %1823 = vadd.xlane.f32.xlu1 %v1822_v43  ;;  %1772 = vadd.xlane.f32.xlu0 %v1771_v44  ;;  %v1547_v50 = vmax.f32 %v554_v45, 0.0 }
 0x12c   :  { %v558_v48 = vpop.f32.mrf.mxu0  ;;  %v719_v49 = vpop.f32.mrf.mxu1 }
 0x12d   :  { %v1825_v51 = vadd.f32 %v1549_v47, %v1548_v23  ;;  %v1564_v24 = vmax.f32 %v719_v49, 0.0  ;;  %v1777_v60 = vadd.f32 %v1547_v50, %v1546_v55  ;;  %v1562_v63 = vmax.f32 %v558_v48, 0.0 }
 0x12e   :  { %v560_v53 = vpop.f32.mrf.mxu0  ;;  %v721_v54 = vpop.f32.mrf.mxu1 }
 0x12f   :  { %v1565_v18 = vmax.f32 %v721_v54, 0.0  ;;  %1826 = vadd.xlane.f32.xlu1 %v1825_v51  ;;  %1775 = vadd.xlane.f32.xlu0 %v1774_v52  ;;  %v1563_v58 = vmax.f32 %v560_v53, 0.0 }
 0x130   :  { %v564_v56 = vpop.f32.mrf.mxu0  ;;  %v725_v57 = vpop.f32.mrf.mxu1 }
 0x131   :  { %v1828_v59 = vadd.f32 %v1565_v18, %v1564_v24  ;;  %v1580_v25 = vmax.f32 %v725_v57, 0.0  ;;  %v1780_v5 = vadd.f32 %v1563_v58, %v1562_v63  ;;  %v1578_v8 = vmax.f32 %v564_v56, 0.0 }
 0x132   :  { %v566_v61 = vpop.f32.mrf.mxu0  ;;  %v727_v62 = vpop.f32.mrf.mxu1 }
 0x133   :  { %v1581_v0 = vmax.f32 %v727_v62, 0.0  ;;  %1829 = vadd.xlane.f32.xlu1 %v1828_v59  ;;  %1778 = vadd.xlane.f32.xlu0 %v1777_v60  ;;  %v1579_v2 = vmax.f32 %v566_v61, 0.0 }
 0x134   :  { %v570_v19 = vpop.f32.mrf.mxu0  ;;  %v731_v1 = vpop.f32.mrf.mxu1 }
 0x135   :  { %v1831_v4 = vadd.f32 %v1581_v0, %v1580_v25  ;;  %v1596_v9 = vmax.f32 %v731_v1, 0.0  ;;  %v1783_v14 = vadd.f32 %v1579_v2, %v1578_v8  ;;  %v1594_v28 = vmax.f32 %v570_v19, 0.0 }
 0x136   :  { %v572_v6 = vpop.f32.mrf.mxu0  ;;  %v733_v7 = vpop.f32.mrf.mxu1 }
 0x137   :  { %v1597_v10 = vmax.f32 %v733_v7, 0.0  ;;  %1832 = vadd.xlane.f32.xlu1 %v1831_v4  ;;  %1781 = vadd.xlane.f32.xlu0 %v1780_v5  ;;  %v1595_v12 = vmax.f32 %v572_v6, 0.0 }
 0x138   :  { %v576_v20 = vpop.f32.mrf.mxu0  ;;  %v737_v11 = vpop.f32.mrf.mxu1 }
 0x139   :  { %v1834_v13 = vadd.f32 %v1597_v10, %v1596_v9  ;;  %v1612_v15 = vmax.f32 %v737_v11, 0.0  ;;  %v1786_v33 = vadd.f32 %v1595_v12, %v1594_v28  ;;  %v1610_v36 = vmax.f32 %v576_v20, 0.0 }
 0x13a   :  { %v578_v26 = vpop.f32.mrf.mxu0  ;;  %v739_v27 = vpop.f32.mrf.mxu1 }
 0x13b   :  { %v1613_v29 = vmax.f32 %v739_v27, 0.0  ;;  %1835 = vadd.xlane.f32.xlu1 %v1834_v13  ;;  %1784 = vadd.xlane.f32.xlu0 %v1783_v14  ;;  %v1611_v31 = vmax.f32 %v578_v26, 0.0 }
 0x13c   :  { %v582_v30 = vpop.f32.mrf.mxu0  ;;  %v743_v21 = vpop.f32.mrf.mxu1 }
 0x13d   :  { %v1837_v32 = vadd.f32 %v1613_v29, %v1612_v15  ;;  %v1628_v37 = vmax.f32 %v743_v21, 0.0  ;;  %v1789_v41 = vadd.f32 %v1611_v31, %v1610_v36  ;;  %v1626_v44 = vmax.f32 %v582_v30, 0.0 }
 0x13e   :  { %v584_v34 = vpop.f32.mrf.mxu0  ;;  %v745_v35 = vpop.f32.mrf.mxu1 }
 0x13f   :  { %v1629_v16 = vmax.f32 %v745_v35, 0.0  ;;  %1838 = vadd.xlane.f32.xlu1 %v1837_v32  ;;  %1787 = vadd.xlane.f32.xlu0 %v1786_v33  ;;  %v1627_v39 = vmax.f32 %v584_v34, 0.0 }
 0x140   :  { %v588_v38 = vpop.f32.mrf.mxu0  ;;  %v749_v22 = vpop.f32.mrf.mxu1 }
 0x141   :  { %v1840_v40 = vadd.f32 %v1629_v16, %v1628_v37  ;;  %v1644_v45 = vmax.f32 %v749_v22, 0.0  ;;  %v1792_v49 = vadd.f32 %v1627_v39, %v1626_v44  ;;  %v1642_v52 = vmax.f32 %v588_v38, 0.0 }
 0x142   :  { %v590_v42 = vpop.f32.mrf.mxu0  ;;  %v751_v43 = vpop.f32.mrf.mxu1 }
 0x143   :  { %v1645_v46 = vmax.f32 %v751_v43, 0.0  ;;  %1841 = vadd.xlane.f32.xlu1 %v1840_v40  ;;  %1790 = vadd.xlane.f32.xlu0 %v1789_v41  ;;  %v1643_v47 = vmax.f32 %v590_v42, 0.0 }
 0x144   :  { %v820_v17 = vpop.f32.mrf.mxu0  ;;  %v981_v23 = vpop.f32.mrf.mxu1 }
 0x145   :  { %v1843_v48 = vadd.f32 %v1645_v46, %v1644_v45  ;;  %v1406_v53 = vmax.f32 %v820_v17, 0.0  ;;  %v1795_v56 = vadd.f32 %v1643_v47, %v1642_v52  ;;  %v1408_v60 = vmax.f32 %v981_v23, 0.0 }
 0x146   :  { %v822_v50 = vpop.f32.mrf.mxu0  ;;  %v983_v51 = vpop.f32.mrf.mxu1 }
 0x147   :  { %v1407_v54 = vmax.f32 %v822_v50, 0.0  ;;  %1844 = vadd.xlane.f32.xlu1 %v1843_v48  ;;  %1793 = vadd.xlane.f32.xlu0 %v1792_v49  ;;  %v1409_v18 = vmax.f32 %v983_v51, 0.0 }
 0x148   :  { %v826_v55 = vpop.f32.mrf.mxu0  ;;  %v987_v24 = vpop.f32.mrf.mxu1 }
 0x149   :  { %v1846_v57 = vadd.f32 %v1407_v54, %v1406_v53  ;;  %v1424_v61 = vmax.f32 %v987_v24, 0.0  ;;  %v1894_v1 = vadd.f32 %v1409_v18, %v1408_v60  ;;  %v1422_v5 = vmax.f32 %v826_v55, 0.0 }
 0x14a   :  { %v828_v58 = vpop.f32.mrf.mxu0  ;;  %v989_v59 = vpop.f32.mrf.mxu1 }
 0x14b   :  { %v1425_v62 = vmax.f32 %v989_v59, 0.0  ;;  %1796 = vadd.xlane.f32.xlu0 %v1795_v56  ;;  %1847 = vadd.xlane.f32.xlu1 %v1846_v57  ;;  %v1423_v0 = vmax.f32 %v828_v58, 0.0 }
 0x14c   :  { %v832_v63 = vpop.f32.mrf.mxu0  ;;  %v993_v25 = vpop.f32.mrf.mxu1 }
 0x14d   :  { %v1897_v19 = vadd.f32 %v1425_v62, %v1424_v61  ;;  %v1440_v6 = vmax.f32 %v993_v25, 0.0  ;;  %v1849_v11 = vadd.f32 %v1423_v0, %v1422_v5  ;;  %v1438_v14 = vmax.f32 %v832_v63, 0.0 }
 0x14e   :  { %v834_v2 = vpop.f32.mrf.mxu0  ;;  %v995_v4 = vpop.f32.mrf.mxu1 }
 0x14f   :  { %v1441_v7 = vmax.f32 %v995_v4, 0.0  ;;  %1898 = vadd.xlane.f32.xlu0 %v1897_v19  ;;  %1895 = vadd.xlane.f32.xlu1 %v1894_v1  ;;  %v1439_v10 = vmax.f32 %v834_v2, 0.0 }
 0x150   :  { %v838_v8 = vpop.f32.mrf.mxu0  ;;  %v999_v9 = vpop.f32.mrf.mxu1 }
 0x151   :  { %v1900_v20 = vadd.f32 %v1441_v7, %v1440_v6  ;;  %v1456_v26 = vmax.f32 %v999_v9, 0.0  ;;  %v1852_v31 = vadd.f32 %v1439_v10, %v1438_v14  ;;  %v1454_v33 = vmax.f32 %v838_v8, 0.0 }
 0x152   :  { %v840_v12 = vpop.f32.mrf.mxu0  ;;  %v1001_v13 = vpop.f32.mrf.mxu1 }
 0x153   :  { %v1457_v27 = vmax.f32 %v1001_v13, 0.0  ;;  %1901 = vadd.xlane.f32.xlu0 %v1900_v20  ;;  %1850 = vadd.xlane.f32.xlu1 %v1849_v11  ;;  %v1455_v29 = vmax.f32 %v840_v12, 0.0 }
 0x154   :  { %v1005_v28 = vpop.f32.mrf.mxu1  ;;  %v1656_v15 = vpop.xlane.xlu0 %1655 }
 0x155   :  { %v844_v30 = vpop.f32.mrf.mxu0  ;;  %v1903_v21 = vadd.f32 %v1457_v27, %v1456_v26  ;;  %v1472_v34 = vmax.f32 %v1005_v28, 0.0  ;;  %v1855_v42 = vadd.f32 %v1455_v29, %v1454_v33 }
 0x156   :  { %v1007_v32 = vpop.f32.mrf.mxu1  ;;  %v1470_v44 = vmax.f32 %v844_v30, 0.0 }
 0x157   :  { %v846_v35 = vpop.f32.mrf.mxu0  ;;  %v1473_v36 = vmax.f32 %v1007_v32, 0.0  ;;  %1904 = vadd.xlane.f32.xlu0 %v1903_v21  ;;  %1853 = vadd.xlane.f32.xlu1 %v1852_v31 }
 0x158   :  { %v1011_v37 = vpop.f32.mrf.mxu1  ;;  %v1704_v16 = vpop.xlane.xlu0 %1703  ;;  %v1471_v38 = vmax.f32 %v846_v35, 0.0 }
 0x159   :  { %v3219_v22 = vsel %vm2038_vm1, %v1656_v15, %v1704_v16  ;;  %v1659_v39 = vpop.xlane.xlu1 %1658  ;;  %v850_v40 = vpop.f32.mrf.mxu0  ;;  %v1906_v41 = vadd.f32 %v1473_v36, %v1472_v34  ;;  %v1488_v45 = vmax.f32 %v1011_v37, 0.0 }
 0x15a   :  { %v1013_v43 = vpop.f32.mrf.mxu1  ;;  %v1858_v53 = vadd.f32 %v1471_v38, %v1470_v44  ;;  %v1486_v55 = vmax.f32 %v850_v40, 0.0 }
 0x15b   :  { %v852_v46 = vpop.f32.mrf.mxu0  ;;  %v1489_v17 = vmax.f32 %v1013_v43, 0.0  ;;  %1907 = vadd.xlane.f32.xlu0 %v1906_v41  ;;  %1856 = vadd.xlane.f32.xlu1 %v1855_v42 }
 0x15c   :  { %v1017_v23 = vpop.f32.mrf.mxu1  ;;  %v1707_v47 = vpop.xlane.xlu0 %1706  ;;  %v1487_v48 = vmax.f32 %v852_v46, 0.0 }
 0x15d   :  { %v3222_v49 = vsel %vm2038_vm1, %v1659_v39, %v1707_v47  ;;  %v1710_v50 = vpop.xlane.xlu1 %1709  ;;  %v856_v51 = vpop.f32.mrf.mxu0  ;;  %v1909_v52 = vadd.f32 %v1489_v17, %v1488_v45  ;;  %v1504_v24 = vmax.f32 %v1017_v23, 0.0 }
 0x15e   :  { %v1019_v54 = vpop.f32.mrf.mxu1  ;;  %v1861_v25 = vadd.f32 %v1487_v48, %v1486_v55  ;;  %v1502_v19 = vmax.f32 %v856_v51, 0.0 }
 0x15f   :  { %v858_v18 = vpop.f32.mrf.mxu0  ;;  %v1505_v56 = vmax.f32 %v1019_v54, 0.0  ;;  %1910 = vadd.xlane.f32.xlu0 %v1909_v52  ;;  %1859 = vadd.xlane.f32.xlu1 %v1858_v53 }
 0x160   :  { %v1023_v57 = vpop.f32.mrf.mxu1  ;;  %v1662_v58 = vpop.xlane.xlu0 %1661  ;;  %v1503_v59 = vmax.f32 %v858_v18, 0.0 }
 0x161   :  { %v3225_v60 = vsel %vm2038_vm1, %v1662_v58, %v1710_v50  ;;  %v1665_v61 = vpop.xlane.xlu1 %1664  ;;  %v862_v62 = vpop.f32.mrf.mxu0  ;;  %v1912_v63 = vadd.f32 %v1505_v56, %v1504_v24  ;;  %v1520_v1 = vmax.f32 %v1023_v57, 0.0 }
 0x162   :  { %v1025_v0 = vpop.f32.mrf.mxu1  ;;  %v1864_v11 = vadd.f32 %v1503_v59, %v1502_v19  ;;  %v1518_v13 = vmax.f32 %v862_v62, 0.0 }
 0x163   :  { %v864_v2 = vpop.f32.mrf.mxu0  ;;  %v1521_v4 = vmax.f32 %v1025_v0, 0.0  ;;  %1913 = vadd.xlane.f32.xlu0 %v1912_v63  ;;  %1862 = vadd.xlane.f32.xlu1 %v1861_v25 }
 0x164   :  { %v1029_v5 = vpop.f32.mrf.mxu1  ;;  %v1713_v6 = vpop.xlane.xlu0 %1712  ;;  %v1519_v7 = vmax.f32 %v864_v2, 0.0 }
 0x165   :  { %v3228_v8 = vsel %vm2038_vm1, %v1665_v61, %v1713_v6  ;;  %v1668_v9 = vpop.xlane.xlu1 %1667  ;;  %v868_v10 = vpop.f32.mrf.mxu0  ;;  %v1915_v20 = vadd.f32 %v1521_v4, %v1520_v1  ;;  %v1536_v14 = vmax.f32 %v1029_v5, 0.0 }
 0x166   :  { %v1031_v12 = vpop.f32.mrf.mxu1  ;;  %v1867_v33 = vadd.f32 %v1519_v7, %v1518_v13  ;;  %v1534_v35 = vmax.f32 %v868_v10, 0.0 }
 0x167   :  { %v870_v26 = vpop.f32.mrf.mxu0  ;;  %v1537_v27 = vmax.f32 %v1031_v12, 0.0  ;;  %1916 = vadd.xlane.f32.xlu0 %v1915_v20  ;;  %1865 = vadd.xlane.f32.xlu1 %v1864_v11 }
 0x168   :  { %v1035_v28 = vpop.f32.mrf.mxu1  ;;  %v1716_v15 = vpop.xlane.xlu0 %1715  ;;  %v1535_v29 = vmax.f32 %v870_v26, 0.0 }
 0x169   :  { %v3231_v30 = vsel %vm2038_vm1, %v1668_v9, %v1716_v15  ;;  %v1671_v21 = vpop.xlane.xlu1 %1670  ;;  %v874_v31 = vpop.f32.mrf.mxu0  ;;  %v1918_v32 = vadd.f32 %v1537_v27, %v1536_v14  ;;  %v1552_v36 = vmax.f32 %v1035_v28, 0.0 }
 0x16a   :  { %v1037_v34 = vpop.f32.mrf.mxu1  ;;  %v1870_v45 = vadd.f32 %v1535_v29, %v1534_v35  ;;  %v1550_v17 = vmax.f32 %v874_v31, 0.0 }
 0x16b   :  { %v876_v37 = vpop.f32.mrf.mxu0  ;;  %v1553_v16 = vmax.f32 %v1037_v34, 0.0  ;;  %1919 = vadd.xlane.f32.xlu0 %v1918_v32  ;;  %1868 = vadd.xlane.f32.xlu1 %v1867_v33 }
 0x16c   :  { %v1041_v38 = vpop.f32.mrf.mxu1  ;;  %v1719_v39 = vpop.xlane.xlu0 %1718  ;;  %v1551_v40 = vmax.f32 %v876_v37, 0.0 }
 0x16d   :  { %v3234_v41 = vsel %vm2038_vm1, %v1671_v21, %v1719_v39  ;;  %v1674_v42 = vpop.xlane.xlu1 %1673  ;;  %v880_v43 = vpop.f32.mrf.mxu0  ;;  %v1921_v44 = vadd.f32 %v1553_v16, %v1552_v36  ;;  %v1568_v23 = vmax.f32 %v1041_v38, 0.0 }
 0x16e   :  { %v1043_v46 = vpop.f32.mrf.mxu1  ;;  %v1873_v18 = vadd.f32 %v1551_v40, %v1550_v17  ;;  %v1566_v57 = vmax.f32 %v880_v43, 0.0 }
 0x16f   :  { %v882_v47 = vpop.f32.mrf.mxu0  ;;  %v1569_v48 = vmax.f32 %v1043_v46, 0.0  ;;  %1922 = vadd.xlane.f32.xlu0 %v1921_v44  ;;  %1871 = vadd.xlane.f32.xlu1 %v1870_v45 }
 0x170   :  { %v1047_v50 = vpop.f32.mrf.mxu1  ;;  %v1722_v51 = vpop.xlane.xlu0 %1721  ;;  %v1567_v52 = vmax.f32 %v882_v47, 0.0 }
 0x171   :  { %v3237_v53 = vsel %vm2038_vm1, %v1674_v42, %v1722_v51  ;;  %v1677_v54 = vpop.xlane.xlu1 %1676  ;;  %v886_v55 = vpop.f32.mrf.mxu0  ;;  %v1924_v24 = vadd.f32 %v1569_v48, %v1568_v23  ;;  %v1584_v58 = vmax.f32 %v1047_v50, 0.0 }
 0x172   :  { %v1049_v56 = vpop.f32.mrf.mxu1  ;;  %v1876_v4 = vadd.f32 %v1567_v52, %v1566_v57  ;;  %v1582_v6 = vmax.f32 %v886_v55, 0.0 }
 0x173   :  { %v888_v59 = vpop.f32.mrf.mxu0  ;;  %v1585_v61 = vmax.f32 %v1049_v56, 0.0  ;;  %1925 = vadd.xlane.f32.xlu0 %v1924_v24  ;;  %1874 = vadd.xlane.f32.xlu1 %v1873_v18 }
 0x174   :  { %v1053_v62 = vpop.f32.mrf.mxu1  ;;  %v1725_v63 = vpop.xlane.xlu0 %1724  ;;  %v1583_v25 = vmax.f32 %v888_v59, 0.0 }
 0x175   :  { %v3240_v0 = vsel %vm2038_vm1, %v1677_v54, %v1725_v63  ;;  %v1680_v19 = vpop.xlane.xlu1 %1679  ;;  %v892_v1 = vpop.f32.mrf.mxu0  ;;  %v1927_v2 = vadd.f32 %v1585_v61, %v1584_v58  ;;  %v1600_v7 = vmax.f32 %v1053_v62, 0.0 }
 0x176   :  { %v1055_v5 = vpop.f32.mrf.mxu1  ;;  %v1879_v28 = vadd.f32 %v1583_v25, %v1582_v6  ;;  %v1598_v29 = vmax.f32 %v892_v1, 0.0 }
 0x177   :  { %v894_v9 = vpop.f32.mrf.mxu0  ;;  %v1601_v10 = vmax.f32 %v1055_v5, 0.0  ;;  %1928 = vadd.xlane.f32.xlu0 %v1927_v2  ;;  %1877 = vadd.xlane.f32.xlu1 %v1876_v4 }
 0x178   :  { %v1059_v20 = vpop.f32.mrf.mxu1  ;;  %v1728_v11 = vpop.xlane.xlu0 %1727  ;;  %v1599_v12 = vmax.f32 %v894_v9, 0.0 }
 0x179   :  { %v3243_v13 = vsel %vm2038_vm1, %v1680_v19, %v1728_v11  ;;  %v1683_v14 = vpop.xlane.xlu1 %1682  ;;  %v898_v26 = vpop.f32.mrf.mxu0  ;;  %v1930_v27 = vadd.f32 %v1601_v10, %v1600_v7  ;;  %v1616_v21 = vmax.f32 %v1059_v20, 0.0 }
 0x17a   :  { %v1061_v15 = vpop.f32.mrf.mxu1  ;;  %v1882_v39 = vadd.f32 %v1599_v12, %v1598_v29  ;;  %v1614_v42 = vmax.f32 %v898_v26, 0.0 }
 0x17b   :  { %v900_v31 = vpop.f32.mrf.mxu0  ;;  %v1617_v32 = vmax.f32 %v1061_v15, 0.0  ;;  %1931 = vadd.xlane.f32.xlu0 %v1930_v27  ;;  %1880 = vadd.xlane.f32.xlu1 %v1879_v28 }
 0x17c   :  { %v1065_v33 = vpop.f32.mrf.mxu1  ;;  %v1731_v34 = vpop.xlane.xlu0 %1730  ;;  %v1615_v35 = vmax.f32 %v900_v31, 0.0 }
 0x17d   :  { %v3246_v36 = vsel %vm2038_vm1, %v1683_v14, %v1731_v34  ;;  %v1686_v37 = vpop.xlane.xlu1 %1685  ;;  %v904_v16 = vpop.f32.mrf.mxu0  ;;  %v1933_v38 = vadd.f32 %v1617_v32, %v1616_v21  ;;  %v1632_v43 = vmax.f32 %v1065_v33, 0.0 }
 0x17e   :  { %v1067_v40 = vpop.f32.mrf.mxu1  ;;  %v1885_v52 = vadd.f32 %v1615_v35, %v1614_v42  ;;  %v1630_v55 = vmax.f32 %v904_v16, 0.0 }
 0x17f   :  { %v906_v44 = vpop.f32.mrf.mxu0  ;;  %v1633_v45 = vmax.f32 %v1067_v40, 0.0  ;;  %1934 = vadd.xlane.f32.xlu0 %v1933_v38  ;;  %1883 = vadd.xlane.f32.xlu1 %v1882_v39 }
 0x180   :  { %v1071_v46 = vpop.f32.mrf.mxu1  ;;  %v1734_v17 = vpop.xlane.xlu0 %1733  ;;  %v1631_v23 = vmax.f32 %v906_v44, 0.0 }
 0x181   :  { %v3249_v47 = vsel %vm2038_vm1, %v1686_v37, %v1734_v17  ;;  %v1689_v48 = vpop.xlane.xlu1 %1688  ;;  %v910_v50 = vpop.f32.mrf.mxu0  ;;  %v1936_v51 = vadd.f32 %v1633_v45, %v1632_v43  ;;  %v1648_v19 = vmax.f32 %v1071_v46, 0.0 }
 0x182   :  { %v1073_v54 = vpop.f32.mrf.mxu1  ;;  %v1646_v18 = vmax.f32 %v910_v50, 0.0  ;;  %v1888_v25 = vadd.f32 %v1631_v23, %v1630_v55 }
 0x183   :  { %v912_v24 = vpop.f32.mrf.mxu0  ;;  %1937 = vadd.xlane.f32.xlu0 %v1936_v51  ;;  %1886 = vadd.xlane.f32.xlu1 %v1885_v52  ;;  %v1649_v1 = vmax.f32 %v1073_v54, 0.0 }
 0x184   :  { %v1647_v56 = vmax.f32 %v912_v24, 0.0  ;;  %v1303_v57 = vpop.f32.mrf.mxu1  ;;  %v1737_v58 = vpop.xlane.xlu0 %1736 }
 0x185   :  { %v1412_v59 = vmax.f32 %v1303_v57, 0.0  ;;  %v3252_v61 = vsel %vm2038_vm1, %v1689_v48, %v1737_v58  ;;  %v1692_v62 = vpop.xlane.xlu1 %1691  ;;  %v1142_v63 = vpop.f32.mrf.mxu0  ;;  %v1939_v15 = vadd.f32 %v1649_v1, %v1648_v19 }
 0x186   :  { %v1305_v2 = vpop.f32.mrf.mxu1  ;;  %v1891_v4 = vadd.f32 %v1647_v56, %v1646_v18  ;;  %v1410_v26 = vmax.f32 %v1142_v63, 0.0 }
 0x187   :  { %v1144_v5 = vpop.f32.mrf.mxu0  ;;  %v1413_v6 = vmax.f32 %v1305_v2, 0.0  ;;  %1889 = vadd.xlane.f32.xlu1 %v1888_v25 }
 0x188   :  { %1892 = vadd.xlane.f32.xlu0 %v1891_v4  ;;  %v1309_v7 = vpop.f32.mrf.mxu1  ;;  %v1740_v9 = vpop.xlane.xlu0 %1739  ;;  %v1411_v27 = vmax.f32 %v1144_v5, 0.0 }
 0x189   :  { %v1428_v10 = vmax.f32 %v1309_v7, 0.0  ;;  %v3255_v20 = vsel %vm2038_vm1, %v1692_v62, %v1740_v9  ;;  %v1695_v11 = vpop.xlane.xlu1 %1694  ;;  %v1148_v12 = vpop.f32.mrf.mxu0  ;;  %v1990_v14 = vadd.f32 %v1413_v6, %v1412_v59 }
 0x18a   :  { %v1311_v28 = vpop.f32.mrf.mxu1  ;;  %v1942_v38 = vadd.f32 %v1411_v27, %v1410_v26  ;;  %v1426_v39 = vmax.f32 %v1148_v12, 0.0 }
 0x18b   :  { %v1150_v29 = vpop.f32.mrf.mxu0  ;;  %v1429_v21 = vmax.f32 %v1311_v28, 0.0  ;;  %1991 = vadd.xlane.f32.xlu1 %v1990_v14 }
 0x18c   :  { %1940 = vadd.xlane.f32.xlu0 %v1939_v15  ;;  %v1315_v31 = vpop.f32.mrf.mxu1  ;;  %v1743_v32 = vpop.xlane.xlu0 %1742  ;;  %v1427_v40 = vmax.f32 %v1150_v29, 0.0 }
 0x18d   :  { %v1444_v33 = vmax.f32 %v1315_v31, 0.0  ;;  %v3258_v34 = vsel %vm2038_vm1, %v1695_v11, %v1743_v32  ;;  %v3260_v35 = vpop.xlane.xlu1 %1697  ;;  %v1154_v37 = vpop.f32.mrf.mxu0  ;;  %v1993_v16 = vadd.f32 %v1429_v21, %v1428_v10 }
 0x18e   :  { %v1317_v42 = vpop.f32.mrf.mxu1  ;;  %v1945_v51 = vadd.f32 %v1427_v40, %v1426_v39  ;;  %v1442_v52 = vmax.f32 %v1154_v37, 0.0 }
 0x18f   :  { %v1156_v43 = vpop.f32.mrf.mxu0  ;;  %v1445_v44 = vmax.f32 %v1317_v42, 0.0  ;;  %1994 = vadd.xlane.f32.xlu1 %v1993_v16 }
 0x190   :  { %1943 = vadd.xlane.f32.xlu0 %v1942_v38  ;;  %v1321_v45 = vpop.f32.mrf.mxu1  ;;  %v3262_v46 = vpop.xlane.xlu0 %1745  ;;  %v1443_v54 = vmax.f32 %v1156_v43, 0.0 }
 0x191   :  { %v1996_v17 = vadd.f32 %v1445_v44, %v1444_v33  ;;  %v1460_v23 = vmax.f32 %v1321_v45, 0.0  ;;  %v1701_v48 = vpop.xlane.xlu1 %1700  ;;  %v1160_v50 = vpop.f32.mrf.mxu0 }
 0x192   :  { %v1323_v55 = vpop.f32.mrf.mxu1  ;;  %v1948_v19 = vadd.f32 %v1443_v54, %v1442_v52  ;;  %v1458_v1 = vmax.f32 %v1160_v50, 0.0 }
 0x193   :  { %v1162_v24 = vpop.f32.mrf.mxu0  ;;  %v1461_v18 = vmax.f32 %v1323_v55, 0.0  ;;  %1997 = vadd.xlane.f32.xlu1 %v1996_v17 }
 0x194   :  { %1946 = vadd.xlane.f32.xlu0 %v1945_v51  ;;  %v1327_v56 = vpop.f32.mrf.mxu1  ;;  %v1749_v57 = vpop.xlane.xlu0 %1748  ;;  %v1459_v2 = vmax.f32 %v1162_v24, 0.0 }
 0x195   :  { %v1999_v58 = vadd.f32 %v1461_v18, %v1460_v23  ;;  %v1476_v59 = vmax.f32 %v1327_v56, 0.0  ;;  %v3265_v62 = vsel %vm2038_vm1, %v1701_v48, %v1749_v57  ;;  %v1752_v63 = vpop.xlane.xlu1 %1751  ;;  %v1166_v25 = vpop.f32.mrf.mxu0 }
 0x196   :  { %v2056_v4 = vsel %vm2055_vm2, %v3219_v22, %v1752_v63  ;;  %v1329_v5 = vpop.f32.mrf.mxu1  ;;  %v1951_v28 = vadd.f32 %v1459_v2, %v1458_v1  ;;  %v1474_v15 = vmax.f32 %v1166_v25, 0.0 }
 0x197   :  { %v1168_v6 = vpop.f32.mrf.mxu0  ;;  %v1477_v7 = vmax.f32 %v1329_v5, 0.0  ;;  %2000 = vadd.xlane.f32.xlu1 %v1999_v58 }
 0x198   :  { %1949 = vadd.xlane.f32.xlu0 %v1948_v19  ;;  %v1333_v9 = vpop.f32.mrf.mxu1  ;;  %v1755_v10 = vpop.xlane.xlu0 %1754  ;;  %v1475_v29 = vmax.f32 %v1168_v6, 0.0 }
 0x199   :  { %v2002_v11 = vadd.f32 %v1477_v7, %v1476_v59  ;;  %v1492_v12 = vmax.f32 %v1333_v9, 0.0  ;;  %v1800_v14 = vpop.xlane.xlu1 %1799  ;;  %v2057_v26 = vsel %vm2055_vm2, %v3222_v49, %v1755_v10  ;;  %v1172_v27 = vpop.f32.mrf.mxu0 }
 0x19a   :  { %v3272_v22 = vsel %vm2072_vm3, %v2056_v4, %v1800_v14  ;;  %v1335_v21 = vpop.f32.mrf.mxu1  ;;  %v1954_v42 = vadd.f32 %v1475_v29, %v1474_v15  ;;  %v1490_v43 = vmax.f32 %v1172_v27, 0.0 }
 0x19b   :  { %v1174_v31 = vpop.f32.mrf.mxu0  ;;  %v1493_v32 = vmax.f32 %v1335_v21, 0.0  ;;  %2003 = vadd.xlane.f32.xlu1 %v2002_v11 }
 0x19c   :  { %1952 = vadd.xlane.f32.xlu0 %v1951_v28  ;;  %v1339_v33 = vpop.f32.mrf.mxu1  ;;  %v1803_v37 = vpop.xlane.xlu0 %1802  ;;  %v1491_v44 = vmax.f32 %v1174_v31, 0.0 }
 0x19d   :  { %v2005_v16 = vadd.f32 %v1493_v32, %v1492_v12  ;;  %v1508_v38 = vmax.f32 %v1339_v33, 0.0  ;;  %v1806_v39 = vpop.xlane.xlu1 %1805  ;;  %v3275_v40 = vsel %vm2072_vm3, %v2057_v26, %v1803_v37  ;;  %v1178_v49 = vpop.f32.mrf.mxu0 }
 0x19e   :  { %v1341_v45 = vpop.f32.mrf.mxu1  ;;  %v1957_v18 = vadd.f32 %v1491_v44, %v1490_v43  ;;  %v1506_v56 = vmax.f32 %v1178_v49, 0.0 }
 0x19f   :  { %v1180_v17 = vpop.f32.mrf.mxu0  ;;  %v1509_v23 = vmax.f32 %v1341_v45, 0.0  ;;  %2006 = vadd.xlane.f32.xlu1 %v2005_v16 }
 0x1a0   :  { %1955 = vadd.xlane.f32.xlu0 %v1954_v42  ;;  %v1345_v48 = vpop.f32.mrf.mxu1  ;;  %v1758_v50 = vpop.xlane.xlu0 %1757  ;;  %v1507_v57 = vmax.f32 %v1180_v17, 0.0 }
 0x1a1   :  { %v2008_v51 = vadd.f32 %v1509_v23, %v1508_v38  ;;  %v1524_v52 = vmax.f32 %v1345_v48, 0.0  ;;  %v1809_v54 = vpop.xlane.xlu1 %1808  ;;  %v2058_v55 = vsel %vm2055_vm2, %v3225_v60, %v1758_v50  ;;  %v1184_v24 = vpop.f32.mrf.mxu0 }
 0x1a2   :  { %v1347_v58 = vpop.f32.mrf.mxu1  ;;  %v3280_v59 = vsel %vm2072_vm3, %v2058_v55, %v1806_v39  ;;  %v1960_v7 = vadd.f32 %v1507_v57, %v1506_v56  ;;  %v1522_v9 = vmax.f32 %v1184_v24, 0.0 }
 0x1a3   :  { %v1186_v63 = vpop.f32.mrf.mxu0  ;;  %v1525_v25 = vmax.f32 %v1347_v58, 0.0  ;;  %2009 = vadd.xlane.f32.xlu1 %v2008_v51 }
 0x1a4   :  { %1958 = vadd.xlane.f32.xlu0 %v1957_v18  ;;  %v1351_v19 = vpop.f32.mrf.mxu1  ;;  %v1761_v1 = vpop.xlane.xlu0 %1760  ;;  %v1523_v10 = vmax.f32 %v1186_v63, 0.0 }
 0x1a5   :  { %v2011_v2 = vadd.f32 %v1525_v25, %v1524_v52  ;;  %v1540_v4 = vmax.f32 %v1351_v19, 0.0  ;;  %v1812_v5 = vpop.xlane.xlu1 %1811  ;;  %v2059_v60 = vsel %vm2055_vm2, %v3228_v8, %v1761_v1  ;;  %v1190_v6 = vpop.f32.mrf.mxu0 }
 0x1a6   :  { %v1353_v11 = vpop.f32.mrf.mxu1  ;;  %v3285_v12 = vsel %vm2072_vm3, %v2059_v60, %v1809_v54  ;;  %v1963_v32 = vadd.f32 %v1523_v10, %v1522_v9  ;;  %v1538_v33 = vmax.f32 %v1190_v6, 0.0 }
 0x1a7   :  { %v1192_v14 = vpop.f32.mrf.mxu0  ;;  %v1541_v26 = vmax.f32 %v1353_v11, 0.0  ;;  %2012 = vadd.xlane.f32.xlu1 %v2011_v2 }
 0x1a8   :  { %1961 = vadd.xlane.f32.xlu0 %v1960_v7  ;;  %v1357_v27 = vpop.f32.mrf.mxu1  ;;  %v1764_v28 = vpop.xlane.xlu0 %1763  ;;  %v1539_v37 = vmax.f32 %v1192_v14, 0.0 }
 0x1a9   :  { %v2014_v15 = vadd.f32 %v1541_v26, %v1540_v4  ;;  %v1556_v29 = vmax.f32 %v1357_v27, 0.0  ;;  %v1815_v21 = vpop.xlane.xlu1 %1814  ;;  %v2060_v8 = vsel %vm2055_vm2, %v3231_v30, %v1764_v28  ;;  %v1196_v31 = vpop.f32.mrf.mxu0 }
 0x1aa   :  { %v1359_v16 = vpop.f32.mrf.mxu1  ;;  %v3290_v38 = vsel %vm2072_vm3, %v2060_v8, %v1812_v5  ;;  %v1966_v48 = vadd.f32 %v1539_v37, %v1538_v33  ;;  %v1554_v50 = vmax.f32 %v1196_v31, 0.0 }
 0x1ab   :  { %v1198_v39 = vpop.f32.mrf.mxu0  ;;  %v1557_v49 = vmax.f32 %v1359_v16, 0.0  ;;  %2015 = vadd.xlane.f32.xlu1 %v2014_v15 }
 0x1ac   :  { %1964 = vadd.xlane.f32.xlu0 %v1963_v32  ;;  %v1363_v42 = vpop.f32.mrf.mxu1  ;;  %v1767_v43 = vpop.xlane.xlu0 %1766  ;;  %v1555_v51 = vmax.f32 %v1198_v39, 0.0 }
 0x1ad   :  { %v2017_v44 = vadd.f32 %v1557_v49, %v1556_v29  ;;  %v1572_v45 = vmax.f32 %v1363_v42, 0.0  ;;  %v1818_v17 = vpop.xlane.xlu1 %1817  ;;  %v2061_v30 = vsel %vm2055_vm2, %v3234_v41, %v1767_v43  ;;  %v1202_v23 = vpop.f32.mrf.mxu0 }
 0x1ae   :  { %v1365_v52 = vpop.f32.mrf.mxu1  ;;  %v3295_v54 = vsel %vm2072_vm3, %v2061_v30, %v1815_v21  ;;  %v1969_v19 = vadd.f32 %v1555_v51, %v1554_v50  ;;  %v1570_v1 = vmax.f32 %v1202_v23, 0.0 }
 0x1af   :  { %v1204_v55 = vpop.f32.mrf.mxu0  ;;  %v1573_v24 = vmax.f32 %v1365_v52, 0.0  ;;  %2018 = vadd.xlane.f32.xlu1 %v2017_v44 }
 0x1b0   :  { %1967 = vadd.xlane.f32.xlu0 %v1966_v48  ;;  %v1369_v18 = vpop.f32.mrf.mxu1  ;;  %v1770_v56 = vpop.xlane.xlu0 %1769  ;;  %v1571_v2 = vmax.f32 %v1204_v55, 0.0 }
 0x1b1   :  { %v2020_v57 = vadd.f32 %v1573_v24, %v1572_v45  ;;  %v1588_v58 = vmax.f32 %v1369_v18, 0.0  ;;  %v1821_v63 = vpop.xlane.xlu1 %1820  ;;  %v2062_v41 = vsel %vm2055_vm2, %v3237_v53, %v1770_v56  ;;  %v1208_v25 = vpop.f32.mrf.mxu0 }
 0x1b2   :  { %v1371_v4 = vpop.f32.mrf.mxu1  ;;  %v3300_v5 = vsel %vm2072_vm3, %v2062_v41, %v1818_v17  ;;  %v1972_v27 = vadd.f32 %v1571_v2, %v1570_v1  ;;  %v1586_v28 = vmax.f32 %v1208_v25, 0.0 }
 0x1b3   :  { %v1210_v60 = vpop.f32.mrf.mxu0  ;;  %v1589_v6 = vmax.f32 %v1371_v4, 0.0  ;;  %2021 = vadd.xlane.f32.xlu1 %v2020_v57 }
 0x1b4   :  { %1970 = vadd.xlane.f32.xlu0 %v1969_v19  ;;  %v1375_v7 = vpop.f32.mrf.mxu1  ;;  %v1773_v9 = vpop.xlane.xlu0 %1772  ;;  %v1587_v15 = vmax.f32 %v1210_v60, 0.0 }
 0x1b5   :  { %v2023_v10 = vadd.f32 %v1589_v6, %v1588_v58  ;;  %v1604_v11 = vmax.f32 %v1375_v7, 0.0  ;;  %v1824_v14 = vpop.xlane.xlu1 %1823  ;;  %v2063_v53 = vsel %vm2055_vm2, %v3240_v0, %v1773_v9  ;;  %v1214_v26 = vpop.f32.mrf.mxu0 }
 0x1b6   :  { %v1377_v29 = vpop.f32.mrf.mxu1  ;;  %v3305_v21 = vsel %vm2072_vm3, %v2063_v53, %v1821_v63  ;;  %v1602_v32 = vmax.f32 %v1214_v26, 0.0  ;;  %v1975_v44 = vadd.f32 %v1587_v15, %v1586_v28 }
 0x1b7   :  { %v1216_v8 = vpop.f32.mrf.mxu0  ;;  %v1605_v31 = vmax.f32 %v1377_v29, 0.0  ;;  %2024 = vadd.xlane.f32.xlu1 %v2023_v10 }
 0x1b8   :  { %1973 = vadd.xlane.f32.xlu0 %v1972_v27  ;;  %v1381_v33 = vpop.f32.mrf.mxu1  ;;  %v1776_v37 = vpop.xlane.xlu0 %1775  ;;  %v1603_v16 = vmax.f32 %v1216_v8, 0.0 }
 0x1b9   :  { %v2026_v39 = vadd.f32 %v1605_v31, %v1604_v11  ;;  %v1620_v49 = vmax.f32 %v1381_v33, 0.0  ;;  %v1827_v42 = vpop.xlane.xlu1 %1826  ;;  %v2064_v0 = vsel %vm2055_vm2, %v3243_v13, %v1776_v37  ;;  %v1220_v43 = vpop.f32.mrf.mxu0 }
 0x1ba   :  { %v1383_v45 = vpop.f32.mrf.mxu1  ;;  %v3310_v17 = vsel %vm2072_vm3, %v2064_v0, %v1824_v14  ;;  %v1978_v51 = vadd.f32 %v1603_v16, %v1602_v32  ;;  %v1618_v13 = vmax.f32 %v1220_v43, 0.0 }
 0x1bb   :  { %v1222_v30 = vpop.f32.mrf.mxu0  ;;  %v1621_v23 = vmax.f32 %v1383_v45, 0.0  ;;  %2027 = vadd.xlane.f32.xlu1 %v2026_v39 }
 0x1bc   :  { %1976 = vadd.xlane.f32.xlu0 %v1975_v44  ;;  %v1779_v48 = vpop.xlane.xlu0 %1778  ;;  %v1387_v50 = vpop.f32.mrf.mxu1  ;;  %v1619_v56 = vmax.f32 %v1222_v30, 0.0  ;;  %v2053_v44 = vsel %vm2038_vm1, %v3260_v35, %v3262_v46 }
 0x1bd   :  { %v2029_v52 = vadd.f32 %v1621_v23, %v1620_v49  ;;  %v1830_v55 = vpop.xlane.xlu1 %1829  ;;  %v2065_v24 = vsel %vm2055_vm2, %v3246_v36, %v1779_v48  ;;  %v1226_v18 = vpop.f32.mrf.mxu0  ;;  %v1636_v19 = vmax.f32 %v1387_v50, 0.0 }
 0x1be   :  { %v1634_v57 = vmax.f32 %v1226_v18, 0.0  ;;  %v1389_v58 = vpop.f32.mrf.mxu1  ;;  %v3315_v63 = vsel %vm2072_vm3, %v2065_v24, %v1827_v42  ;;  %v1981_v7 = vadd.f32 %v1619_v56, %v1618_v13  ;;  %v2219_v24 = vld [vmem:[%s3631_s2 + $0x70] sm:$0xff]  ;;  %v2218_v18 = vld [vmem:[%s3631_s2 + $0x68] sm:$0xff] }
 0x1bf   :  { %v1228_v41 = vpop.f32.mrf.mxu0  ;;  %2030 = vadd.xlane.f32.xlu1 %v2029_v52  ;;  %v1637_v2 = vmax.f32 %v1389_v58, 0.0 }
 0x1c0   :  { %v1635_v25 = vmax.f32 %v1228_v41, 0.0  ;;  %1979 = vadd.xlane.f32.xlu0 %v1978_v51  ;;  %v1782_v1 = vpop.xlane.xlu0 %1781  ;;  %v1393_v4 = vpop.f32.mrf.mxu1 }
 0x1c1   :  { %v1833_v60 = vpop.xlane.xlu1 %1832  ;;  %v2066_v36 = vsel %vm2055_vm2, %v3249_v47, %v1782_v1  ;;  %v1232_v6 = vpop.f32.mrf.mxu0  ;;  %v2032_v27 = vadd.f32 %v1637_v2, %v1636_v19  ;;  %v1652_v28 = vmax.f32 %v1393_v4, 0.0  ;;  %v2215_v1 = vld [vmem:[%s3631_s2 + $0x50] sm:$0xff] }
 0x1c2   :  { %v1984_v9 = vadd.f32 %v1635_v25, %v1634_v57  ;;  %v1650_v10 = vmax.f32 %v1232_v6, 0.0  ;;  %v1395_v11 = vpop.f32.mrf.mxu1  ;;  %v3320_v14 = vsel %vm2072_vm3, %v2066_v36, %v1830_v55  ;;  %v2220_v55 = vld [vmem:[%s3631_s2 + $0x78] sm:$0xff]  ;;  %v2217_v57 = vld [vmem:[%s3631_s2 + $0x60] sm:$0xff] }
 0x1c3   :  { %v1234_v53 = vpop.f32.mrf.mxu0  ;;  %v1653_v29 = vmax.f32 %v1395_v11, 0.0  ;;  %2581 = vmatpush3.msra.mxu0 %v2220_v55  ;;  %v2216_v25 = vld [vmem:[%s3631_s2 + $0x58] sm:$0xff]  ;;  %v2213_v6 = vld [vmem:[%s3631_s2 + $0x40] sm:$0xff] }
 0x1c4   :  { %v1651_v26 = vmax.f32 %v1234_v53, 0.0  ;;  %1982 = vadd.xlane.f32.xlu0 %v1981_v7  ;;  %1985 = vadd.xlane.f32.xlu1 %v1984_v9  ;;  %v1785_v15 = vpop.xlane.xlu0 %1784  ;;  %v2211_v53 = vld [vmem:[%s3631_s2 + $0x30] sm:$0xff] }
 0x1c5   :  { %v1836_v8 = vpop.xlane.xlu1 %1835  ;;  %v2067_v47 = vsel %vm2055_vm2, %v3252_v61, %v1785_v15  ;;  %v2035_v33 = vadd.f32 %v1653_v29, %v1652_v28  ;;  %2582 = vmatprep.subr.mxu0 %v2652_v3  ;;  %v2210_v28 = vld [vmem:[%s3631_s2 + $0x28] sm:$0xff]  ;;  %v2209_v29 = vld [vmem:[%s3631_s2 + $0x20] sm:$0xff] }
 0x1c6   :  { %v1987_v31 = vadd.f32 %v1651_v26, %v1650_v10  ;;  %v3325_v32 = vsel %vm2072_vm3, %v2067_v47, %v1833_v60  ;;  %2583 = vmatpush3.msra.mxu0 %v2219_v24  ;;  %v2214_v60 = vld [vmem:[%s3631_s2 + $0x48] sm:$0xff]  ;;  %v2212_v10 = vld [vmem:[%s3631_s2 + $0x38] sm:$0xff] }
 0x1c7   :  { %2584 = vmatprep.subr.mxu0 %v2652_v3 }
 0x1c8   :  { %2033 = vadd.xlane.f32.xlu1 %v2032_v27  ;;  %1988 = vadd.xlane.f32.xlu0 %v1987_v31  ;;  %v1788_v37 = vpop.xlane.xlu0 %1787  ;;  %v2208_v31 = vld [vmem:[%s3631_s2 + $0x18] sm:$0xff] }
 0x1c9   :  { %v1839_v16 = vpop.xlane.xlu1 %1838  ;;  %v2068_v39 = vsel %vm2055_vm2, %v3255_v20, %v1788_v37  ;;  %2585 = vmatpush3.msra.mxu0 %v2218_v18  ;;  %v2207_v37 = vld [vmem:[%s3631_s2 + $0x10] sm:$0xff] }
 0x1ca   :  { %v3330_v49 = vsel %vm2072_vm3, %v2068_v39, %v1836_v8  ;;  %2586 = vmatprep.subr.mxu0 %v2652_v3 }
 0x1cb   :  { %2587 = vmatpush3.msra.mxu0 %v2217_v57 }
 0x1cc   :  { %2036 = vadd.xlane.f32.xlu1 %v2035_v33  ;;  %v1791_v42 = vpop.xlane.xlu0 %1790  ;;  %2588 = vmatprep.subr.mxu0 %v2652_v3 }
 0x1cd   :  { %v1842_v0 = vpop.xlane.xlu1 %1841  ;;  %v2069_v61 = vsel %vm2055_vm2, %v3258_v34, %v1791_v42  ;;  %2589 = vmatpush3.msra.mxu0 %v2216_v25  ;;  %v2206_v42 = vld [vmem:[%s3631_s2 + $0x8] sm:$0xff] }
 0x1ce   :  { %v3335_v43 = vsel %vm2072_vm3, %v2069_v61, %v1839_v16  ;;  %2590 = vmatprep.subr.mxu0 %v2652_v3  ;;  %v2205_v61 = vld [vmem:[%s3631_s2] sm:$0xff] }
 0x1cf   :  { %2591 = vmatpush3.msra.mxu0 %v2215_v1 }
 0x1d0   :  { %v1794_v45 = vpop.xlane.xlu0 %1793  ;;  %2592 = vmatprep.subr.mxu0 %v2652_v3 }
 0x1d1   :  { %v1845_v30 = vpop.xlane.xlu1 %1844  ;;  %v2070_v20 = vsel %vm2055_vm2, %v2053_v44, %v1794_v45  ;;  %2593 = vmatpush3.msra.mxu0 %v2214_v60 }
 0x1d2   :  { %v3342_v23 = vsel %vm2072_vm3, %v2070_v20, %v1842_v0  ;;  %2594 = vmatprep.subr.mxu0 %v2652_v3 }
 0x1d3   :  { %2595 = vmatpush3.msra.mxu0 %v2213_v6 }
 0x1d4   :  { %v1797_v48 = vpop.xlane.xlu0 %1796  ;;  %2596 = vmatprep.subr.mxu0 %v2652_v3 }
 0x1d5   :  { %v2071_v50 = vsel %vm2055_vm2, %v3265_v62, %v1797_v48  ;;  %v1848_v34 = vpop.xlane.xlu1 %1847  ;;  %2597 = vmatpush3.msra.mxu0 %v2212_v10 }
 0x1d6   :  { %v3348_v51 = vsel %vm2089_vm4, %v3272_v22, %v1848_v34  ;;  %v3351_v52 = vsel %vm2072_vm3, %v2071_v50, %v1845_v30  ;;  %2598 = vmatprep.subr.mxu0 %v2652_v3 }
 0x1d7   :  { %2599 = vmatpush3.msra.mxu0 %v2211_v53  ;;  %v2323_v53 = vld [vmem:[%s3632_s3 + $0x70] sm:$0xff] }
 0x1d8   :  { %v1899_v35 = vpop.xlane.xlu0 %1898  ;;  %2600 = vmatprep.subr.mxu0 %v2652_v3 }
 0x1d9   :  { %v3353_v46 = vpop.xlane.xlu1 %1895  ;;  %2601 = vmatpush3.msra.mxu0 %v2210_v28 }
 0x1da   :  { %2602 = vmatprep.subr.mxu0 %v2652_v3 }
 0x1db   :  { %2603 = vmatpush3.msra.mxu0 %v2209_v29  ;;  %v2321_v29 = vld [vmem:[%s3632_s3 + $0x60] sm:$0xff] }
 0x1dc   :  { %v1902_v62 = vpop.xlane.xlu0 %1901  ;;  %2604 = vmatprep.subr.mxu0 %v2652_v3 }
 0x1dd   :  { %v1851_v22 = vpop.xlane.xlu1 %1850  ;;  %2605 = vmatpush3.msra.mxu0 %v2208_v31  ;;  %v2320_v31 = vld [vmem:[%s3632_s3 + $0x58] sm:$0xff] }
 0x1de   :  { %v2091_v13 = vsel %vm2089_vm4, %v3275_v40, %v1851_v22  ;;  %2606 = vmatprep.subr.mxu0 %v2652_v3 }
 0x1df   :  { %v3370_v56 = vsel %vm2106_vm6, %v2091_v13, %v1899_v35  ;;  %2607 = vmatpush3.msra.mxu0 %v2207_v37 }
 0x1e0   :  { %v1905_v58 = vpop.xlane.xlu0 %1904  ;;  %2608 = vmatprep.subr.mxu0 %v2652_v3 }
 0x1e1   :  { %v1854_v41 = vpop.xlane.xlu1 %1853  ;;  %2609 = vmatpush3.msra.mxu0 %v2206_v42 }
 0x1e2   :  { %v2092_v40 = vsel %vm2089_vm4, %v3280_v59, %v1854_v41  ;;  %2610 = vmatprep.subr.mxu0 %v2652_v3 }
 0x1e3   :  { %v3383_v19 = vsel %vm2106_vm6, %v2092_v40, %v1902_v62  ;;  %2611 = vmatpush3.msra.mxu0 %v2205_v61 }
 0x1e4   :  { %v1908_v2 = vpop.xlane.xlu0 %1907 }
 0x1e5   :  { %v1857_v4 = vpop.xlane.xlu1 %1856 }
 0x1e6   :  { %v2093_v59 = vsel %vm2089_vm4, %v3285_v12, %v1857_v4 }
 0x1e7   :  { %v3396_v36 = vsel %vm2106_vm6, %v2093_v59, %v1905_v58 }
 0x1e8   :  { %v1911_v7 = vpop.xlane.xlu0 %1910 }
 0x1e9   :  { %v1860_v9 = vpop.xlane.xlu1 %1859 }
 0x1ea   :  { %v2094_v12 = vsel %vm2089_vm4, %v3290_v38, %v1860_v9 }
 0x1eb   :  { %v3409_v11 = vsel %vm2106_vm6, %v2094_v12, %v1908_v2  ;;  %v2324_v12 = vld [vmem:[%s3632_s3 + $0x78] sm:$0xff] }
 0x1ec   :  { %v1914_v26 = vpop.xlane.xlu0 %1913  ;;  %2616 = vmatpush3.msra.mxu1 %v2324_v12 }
 0x1ed   :  { %v1863_v27 = vpop.xlane.xlu1 %1862  ;;  %2617 = vmatprep.subr.mxu1 %v2652_v3 }
 0x1ee   :  { %v2095_v38 = vsel %vm2089_vm4, %v3295_v54, %v1863_v27  ;;  %2618 = vmatpush3.msra.mxu1 %v2323_v53 }
 0x1ef   :  { %v3422_v15 = vsel %vm2106_vm6, %v2095_v38, %v1911_v7  ;;  %2619 = vmatprep.subr.mxu1 %v2652_v3 }
 0x1f0   :  { %v1917_v8 = vpop.xlane.xlu0 %1916 }
 0x1f1   :  { %v1866_v47 = vpop.xlane.xlu1 %1865 }
 0x1f2   :  { %v2096_v54 = vsel %vm2089_vm4, %v3300_v5, %v1866_v47 }
 0x1f3   :  { %v3435_v33 = vsel %vm2106_vm6, %v2096_v54, %v1914_v26 }
 0x1f4   :  { %v1920_v16 = vpop.xlane.xlu0 %1919 }
 0x1f5   :  { %v1869_v39 = vpop.xlane.xlu1 %1868 }
 0x1f6   :  { %v2097_v5 = vsel %vm2089_vm4, %v3305_v21, %v1869_v39 }
 0x1f7   :  { %v3448_v0 = vsel %vm2106_vm6, %v2097_v5, %v1917_v8  ;;  %v2318_v5 = vld [vmem:[%s3632_s3 + $0x48] sm:$0xff] }
 0x1f8   :  { %v1923_v44 = vpop.xlane.xlu0 %1922 }
 0x1f9   :  { %v1872_v45 = vpop.xlane.xlu1 %1871 }
 0x1fa   :  { %v2098_v30 = vsel %vm2089_vm4, %v3310_v17, %v1872_v45  ;;  %v2317_v45 = vld [vmem:[%s3632_s3 + $0x40] sm:$0xff] }
 0x1fb   :  { %v3458_v21 = vsel %vm2106_vm6, %v2098_v30, %v1920_v16  ;;  %v2319_v16 = vld [vmem:[%s3632_s3 + $0x50] sm:$0xff] }
 0x1fc   :  { %v1926_v20 = vpop.xlane.xlu0 %1925 }
 0x1fd   :  { %v1875_v48 = vpop.xlane.xlu1 %1874 }
 0x1fe   :  { %v2099_v50 = vsel %vm2089_vm4, %v3315_v63, %v1875_v48  ;;  %v2316_v48 = vld [vmem:[%s3632_s3 + $0x38] sm:$0xff] }
 0x1ff   :  { %v3463_v34 = vsel %vm2106_vm6, %v2099_v50, %v1923_v44 }
 0x200   :  { %v1929_v35 = vpop.xlane.xlu0 %1928 }
 0x201   :  { %v1878_v55 = vpop.xlane.xlu1 %1877 }
 0x202   :  { %v2100_v24 = vsel %vm2089_vm4, %v3320_v14, %v1878_v55  ;;  %v2315_v55 = vld [vmem:[%s3632_s3 + $0x30] sm:$0xff] }
 0x203   :  { %v3468_v62 = vsel %vm2106_vm6, %v2100_v24, %v1926_v20 }
 0x204   :  { %v1932_v17 = vpop.xlane.xlu0 %1931 }
 0x205   :  { %v1881_v22 = vpop.xlane.xlu1 %1880 }
 0x206   :  { %v2101_v18 = vsel %vm2089_vm4, %v3325_v32, %v1881_v22  ;;  %v2314_v22 = vld [vmem:[%s3632_s3 + $0x28] sm:$0xff] }
 0x207   :  { %v3473_v13 = vsel %vm2106_vm6, %v2101_v18, %v1929_v35 }
 0x208   :  { %v1935_v63 = vpop.xlane.xlu0 %1934 }
 0x209   :  { %v1884_v57 = vpop.xlane.xlu1 %1883 }
 0x20a   :  { %v2102_v58 = vsel %vm2089_vm4, %v3330_v49, %v1884_v57  ;;  %v2313_v57 = vld [vmem:[%s3632_s3 + $0x20] sm:$0xff] }
 0x20b   :  { %v3478_v41 = vsel %vm2106_vm6, %v2102_v58, %v1932_v17 }
 0x20c   :  { %v1938_v14 = vpop.xlane.xlu0 %1937 }
 0x20d   :  { %v1887_v25 = vpop.xlane.xlu1 %1886 }
 0x20e   :  { %v2103_v40 = vsel %vm2089_vm4, %v3335_v43, %v1887_v25  ;;  %v2107_v43 = vsel %vm2106_vm6, %v3348_v51, %v3353_v46  ;;  %v2322_v46 = vld [vmem:[%s3632_s3 + $0x68] sm:$0xff]  ;;  %v2312_v25 = vld [vmem:[%s3632_s3 + $0x18] sm:$0xff] }
 0x20f   :  { %v3483_v1 = vsel %vm2106_vm6, %v2103_v40, %v1935_v63  ;;  %2620 = vmatpush3.msra.mxu1 %v2322_v46 }
 0x210   :  { %2621 = vmatprep.subr.mxu1 %v2652_v3 }
 0x211   :  { %v1890_v32 = vpop.xlane.xlu1 %1889  ;;  %v1893_v2 = vpop.xlane.xlu0 %1892  ;;  %2622 = vmatpush3.msra.mxu1 %v2321_v29 }
 0x212   :  { %v2104_v4 = vsel %vm2089_vm4, %v3342_v23, %v1890_v32  ;;  %v3489_v60 = vsel %vm2089_vm4, %v3351_v52, %v1893_v2  ;;  %2623 = vmatprep.subr.mxu1 %v2652_v3  ;;  %v2311_v2 = vld [vmem:[%s3632_s3 + $0x10] sm:$0xff] }
 0x213   :  { %v3492_v49 = vsel %vm2106_vm6, %v2104_v4, %v1938_v14  ;;  %2624 = vmatpush3.msra.mxu1 %v2320_v31 }
 0x214   :  { %2625 = vmatprep.subr.mxu1 %v2652_v3 }
 0x215   :  { %v1992_v59 = vpop.xlane.xlu1 %1991  ;;  %v3494_v6 = vpop.xlane.xlu0 %1940  ;;  %2626 = vmatpush3.msra.mxu1 %v2319_v16 }
 0x216   :  { %2627 = vmatprep.subr.mxu1 %v2652_v3 }
 0x217   :  { %2628 = vmatpush3.msra.mxu1 %v2318_v5 }
 0x218   :  { %2629 = vmatprep.subr.mxu1 %v2652_v3 }
 0x219   :  { %v1995_v7 = vpop.xlane.xlu1 %1994  ;;  %v1944_v9 = vpop.xlane.xlu0 %1943  ;;  %2630 = vmatpush3.msra.mxu1 %v2317_v45 }
 0x21a   :  { %v2124_v23 = vsel %vm2123_vm7, %v2107_v43, %v1944_v9  ;;  %2631 = vmatprep.subr.mxu1 %v2652_v3  ;;  %v2310_v43 = vld [vmem:[%s3632_s3 + $0x8] sm:$0xff] }
 0x21b   :  { %v2141_v10 = vsel %vm2140_vm8, %v2124_v23, %v1992_v59  ;;  %2632 = vmatpush3.msra.mxu1 %v2316_v48  ;;  %v2309_v23 = vld [vmem:[%s3632_s3] sm:$0xff]  ;;  %v2122_v48 = vsel %vm2106_vm6, %v3489_v60, %v3494_v6 }
 0x21c   :  { %v2157_v52 = vmul.f32 0.00390625, %v2141_v10  ;;  %2633 = vmatprep.subr.mxu1 %v2652_v3 }
 0x21d   :  { %v1998_v26 = vpop.xlane.xlu1 %1997  ;;  %v1947_v27 = vpop.xlane.xlu0 %1946  ;;  %2634 = vmatpush3.msra.mxu1 %v2315_v55 }
 0x21e   :  { %v2125_v51 = vsel %vm2123_vm7, %v3370_v56, %v1947_v27  ;;  %2173 = vxpose.xlu0.b32.start [1/16] (narrow) %v2157_v52, 8  ;;  %2635 = vmatprep.subr.mxu1 %v2652_v3 }
 0x21f   :  { %v2142_v28 = vsel %vm2140_vm8, %v2125_v51, %v1995_v7  ;;  %2636 = vmatpush3.msra.mxu1 %v2314_v22 }
 0x220   :  { %v2158_v38 = vmul.f32 0.00390625, %v2142_v28  ;;  %2637 = vmatprep.subr.mxu1 %v2652_v3 }
 0x221   :  { %v2001_v8 = vpop.xlane.xlu1 %2000  ;;  %v1950_v47 = vpop.xlane.xlu0 %1949  ;;  %2638 = vmatpush3.msra.mxu1 %v2313_v57 }
 0x222   :  { %v2126_v56 = vsel %vm2123_vm7, %v3383_v19, %v1950_v47  ;;  %2174 = vxpose.xlu0.b32.cont [2/16] (narrow) %v2158_v38, 8  ;;  %2639 = vmatprep.subr.mxu1 %v2652_v3 }
 0x223   :  { %v2143_v54 = vsel %vm2140_vm8, %v2126_v56, %v1998_v26  ;;  %2640 = vmatpush3.msra.mxu1 %v2312_v25 }
 0x224   :  { %v2159_v37 = vmul.f32 0.00390625, %v2143_v54  ;;  %2641 = vmatprep.subr.mxu1 %v2652_v3 }
 0x225   :  { %v2004_v39 = vpop.xlane.xlu1 %2003  ;;  %v1953_v42 = vpop.xlane.xlu0 %1952  ;;  %2642 = vmatpush3.msra.mxu1 %v2311_v2 }
 0x226   :  { %v2127_v19 = vsel %vm2123_vm7, %v3396_v36, %v1953_v42  ;;  %2175 = vxpose.xlu0.b32.cont [3/16] (narrow) %v2159_v37, 8  ;;  %2643 = vmatprep.subr.mxu1 %v2652_v3 }
 0x227   :  { %v2144_v61 = vsel %vm2140_vm8, %v2127_v19, %v2001_v8  ;;  %2644 = vmatpush3.msra.mxu1 %v2310_v43 }
 0x228   :  { %v2160_v44 = vmul.f32 0.00390625, %v2144_v61  ;;  %2645 = vmatprep.subr.mxu1 %v2652_v3 }
 0x229   :  { %v2007_v30 = vpop.xlane.xlu1 %2006  ;;  %v1956_v20 = vpop.xlane.xlu0 %1955  ;;  %2646 = vmatpush3.msra.mxu1 %v2309_v23 }
 0x22a   :  { %v2128_v36 = vsel %vm2123_vm7, %v3409_v11, %v1956_v20  ;;  %2176 = vxpose.xlu0.b32.cont [4/16] (narrow) %v2160_v44, 8 }
 0x22b   :  { %v2145_v50 = vsel %vm2140_vm8, %v2128_v36, %v2004_v39 }
 0x22c   :  { %v2161_v35 = vmul.f32 0.00390625, %v2145_v50 }
 0x22d   :  { %v2010_v24 = vpop.xlane.xlu1 %2009  ;;  %v1959_v17 = vpop.xlane.xlu0 %1958 }
 0x22e   :  { %v2129_v11 = vsel %vm2123_vm7, %v3422_v15, %v1959_v17  ;;  %2177 = vxpose.xlu0.b32.cont [5/16] (narrow) %v2161_v35, 8 }
 0x22f   :  { %v2146_v18 = vsel %vm2140_vm8, %v2129_v11, %v2007_v30  ;;  %v2544_v11 = vld [vmem:[%s3634_s6] ss:$0 sm:$0xff] }
 0x230   :  { %v2162_v63 = vmul.f32 0.00390625, %v2146_v18  ;;  %v2545_v18 = vld [vmem:[%s3637_s4] ss:$0 sm:$0xff] }
 0x231   :  { %v2013_v58 = vpop.xlane.xlu1 %2012  ;;  %v1962_v14 = vpop.xlane.xlu0 %1961 }
 0x232   :  { %v2130_v15 = vsel %vm2123_vm7, %v3435_v33, %v1962_v14  ;;  %2178 = vxpose.xlu0.b32.cont [6/16] (narrow) %v2162_v63, 8 }
 0x233   :  { %v2147_v40 = vsel %vm2140_vm8, %v2130_v15, %v2010_v24 }
 0x234   :  { %v2163_v32 = vmul.f32 0.00390625, %v2147_v40 }
 0x235   :  { %v2016_v4 = vpop.xlane.xlu1 %2015  ;;  %v1965_v59 = vpop.xlane.xlu0 %1964 }
 0x236   :  { %v2131_v33 = vsel %vm2123_vm7, %v3448_v0, %v1965_v59  ;;  %2179 = vxpose.xlu0.b32.cont [7/16] (narrow) %v2163_v32, 8 }
 0x237   :  { %v2148_v7 = vsel %vm2140_vm8, %v2131_v33, %v2013_v58 }
 0x238   :  { %v2164_v9 = vmul.f32 0.00390625, %v2148_v7 }
 0x239   :  { %v2019_v10 = vpop.xlane.xlu1 %2018  ;;  %v1968_v52 = vpop.xlane.xlu0 %1967 }
 0x23a   :  { %v2132_v0 = vsel %vm2123_vm7, %v3458_v21, %v1968_v52  ;;  %2180 = vxpose.xlu0.b32.cont [8/16] (narrow) %v2164_v9, 8 }
 0x23b   :  { %v2149_v12 = vsel %vm2140_vm8, %v2132_v0, %v2016_v4 }
 0x23c   :  { %v2165_v53 = vmul.f32 0.00390625, %v2149_v12 }
 0x23d   :  { %v2022_v26 = vpop.xlane.xlu1 %2021  ;;  %v1971_v27 = vpop.xlane.xlu0 %1970 }
 0x23e   :  { %v2133_v51 = vsel %vm2123_vm7, %v3463_v34, %v1971_v27  ;;  %2181 = vxpose.xlu0.b32.cont [9/16] (narrow) %v2165_v53, 8 }
 0x23f   :  { %v2150_v46 = vsel %vm2140_vm8, %v2133_v51, %v2019_v10 }
 0x240   :  { %v2166_v28 = vmul.f32 0.00390625, %v2150_v46 }
 0x241   :  { %v2025_v38 = vpop.xlane.xlu1 %2024  ;;  %v1974_v29 = vpop.xlane.xlu0 %1973 }
 0x242   :  { %v2134_v21 = vsel %vm2123_vm7, %v3468_v62, %v1974_v29  ;;  %2182 = vxpose.xlu0.b32.cont [10/16] (narrow) %v2166_v28, 8 }
 0x243   :  { %v2151_v3 = vsel %vm2140_vm8, %v2134_v21, %v2022_v26 }
 0x244   :  { %v2167_v8 = vmul.f32 0.00390625, %v2151_v3 }
 0x245   :  { %v2028_v47 = vpop.xlane.xlu1 %2027  ;;  %v1977_v56 = vpop.xlane.xlu0 %1976 }
 0x246   :  { %v2135_v31 = vsel %vm2123_vm7, %v3473_v13, %v1977_v56  ;;  %2183 = vxpose.xlu0.b32.cont [11/16] (narrow) %v2167_v8, 8 }
 0x247   :  { %v2152_v34 = vsel %vm2140_vm8, %v2135_v31, %v2025_v38 }
 0x248   :  { %v2168_v54 = vmul.f32 0.00390625, %v2152_v34 }
 0x249   :  { %v2031_v37 = vpop.xlane.xlu1 %2030  ;;  %v1980_v16 = vpop.xlane.xlu0 %1979 }
 0x24a   :  { %v2136_v39 = vsel %vm2123_vm7, %v3478_v41, %v1980_v16  ;;  %2184 = vxpose.xlu0.b32.cont [12/16] (narrow) %v2168_v54, 8 }
 0x24b   :  { %v2153_v62 = vsel %vm2140_vm8, %v2136_v39, %v2028_v47 }
 0x24c   :  { %v2169_v42 = vmul.f32 0.00390625, %v2153_v62 }
 0x24d   :  { %v1983_v19 = vpop.xlane.xlu0 %1982  ;;  %v1986_v5 = vpop.xlane.xlu1 %1985 }
 0x24e   :  { %v2137_v61 = vsel %vm2123_vm7, %v3483_v1, %v1983_v19  ;;  %2185 = vxpose.xlu0.b32.cont [13/16] (narrow) %v2169_v42, 8  ;;  %v2138_v45 = vsel %vm2123_vm7, %v3492_v49, %v1986_v5  ;;  %v2543_v49 = vld [vmem:[%s3633_s5] ss:$0 sm:$0xff] }
 0x24f   :  { %v2154_v13 = vsel %vm2140_vm8, %v2137_v61, %v2031_v37 }
 0x250   :  { %v2170_v44 = vmul.f32 0.00390625, %v2154_v13 }
 0x251   :  { %v2034_v30 = vpop.xlane.xlu1 %2033  ;;  %v1989_v41 = vpop.xlane.xlu0 %1988 }
 0x252   :  { %v2155_v20 = vsel %vm2140_vm8, %v2138_v45, %v2034_v30  ;;  %2186 = vxpose.xlu0.b32.cont [14/16] (narrow) %v2170_v44, 8  ;;  %v2139_v50 = vsel %vm2123_vm7, %v2122_v48, %v1989_v41 }
 0x253   :  { %v2171_v36 = vmul.f32 0.00390625, %v2155_v20 }
 0x255   :  { %v2037_v1 = vpop.xlane.xlu1 %2036 }
 0x256   :  { %v2156_v35 = vsel %vm2140_vm8, %v2139_v50, %v2037_v1  ;;  %2187 = vxpose.xlu0.b32.cont [15/16] (narrow) %v2171_v36, 8 }
 0x257   :  { %v2172_v55 = vmul.f32 0.00390625, %v2156_v35 }
 0x25a   :  { %2188 = vxpose.xlu0.b32.end [16/16] (narrow) %v2172_v55, 8 }
 0x29a   :  { %v2189_v24 = vpop.trf.xlu0 }
 0x29b   :  { %2613 = vmatmul.mubr.f32.vlgmr.msra.gmra.mxu0 %v2189_v24 }
 0x35b   :  { %v2287_v17 = vpop.f32.mrf.mxu0 }
 0x35c   :  { %2291 = vst [vmem:[%s3635_s7] sm:$0xff] %v2287_v17  ;;  %v2299_v60 = vsub.f32 %v2287_v17, %v2543_v49  ;;  %2648 = vmatmul.mubr.f32.vlgmr.msra.gmra.mxu1 %v2287_v17 }
 0x35d   :  { %v2614_v6 = vpop.f32.mrf.mxu0 }
 0x35e   :  { %v2307_v22 = vmul.f32 %v2544_v11, %v2299_v60 }
 0x360   :  { %2308 = vst [vmem:[%s3636_s8] sm:$0xff] %v2307_v22 }
 0x41c   :  { %v2398_v63 = vpop.f32.mrf.mxu1 }
 0x41d   :  { %v2399_v57 = vadd.f32 %v2545_v18, %v2398_v63 }
 0x41e   :  { %v2649_v58 = vpop.f32.mrf.mxu1 }
 0x41f   :  { %2402 = vst [vmem:[%s3638_s9] sm:$0xff] %v2399_v57 }

</bundles_post_ra>
